<compile_context>
chip_gen: v7x
topology: tpu7x:2x2x1
jax: 0.10.0
libtpu: 0.0.40
codegen_flags: <defaults>
</compile_context>

<pallas_src>
import functools

import jax
import jax.numpy as jnp
from jax import lax
from jax.experimental import pallas as pl
from jax.experimental.pallas import tpu as pltpu

OUT_LANES = 128  # lane-dense output slab width (avoids masked (B,1) stores)


def _round_up(x, m):
    return (x + m - 1) // m * m


def lstm_last_linear_kernel(x_ref, w_ih_ref, w_hh_ref, b_ref,
                            w_out_ref, b_out_ref, out_ref, xproj_ref,
                            *, hidden_size, seq_len, batch_pad, gates_in_bf16):
    """Whole-sequence LSTM + final Linear, single grid point, all data in VMEM.

    x_ref    : (T*B, 4)  time-major, batch-padded, flattened input (f32)
    w_ih_ref : (4, 4H)   f32
    w_hh_ref : (H, 4H)   bf16 (recurrent weight; f32-accumulated on the MXU)
    b_ref    : (1, 4H)   f32 (b_ih + b_hh)
    w_out_ref: (1, H)    f32
    b_out_ref: (1, 1)    f32
    out_ref  : (B, 128)  f32 lane-dense result slab (column 0 is the answer)
    xproj_ref: (T*B, 4H) f32 VMEM scratch for the hoisted input projection
    """
    H, T, B = hidden_size, seq_len, batch_pad

    # ---- 1) Hoisted input projection (+ bias): one MXU call for all T steps.
    xproj_ref[...] = (
        jnp.dot(x_ref[...], w_ih_ref[...], preferred_element_type=jnp.float32)
        + b_ref[...]
    )

    # ---- 2) Recurrence: only h @ w_hh (bf16 operands, f32 acc) + gate math.
    # TODO(synk): keep w_hh resident in the MXU across the T sequential steps
    # via pltpu.matmul_push_rhs / matmul_acc_lhs / matmul_pop (review item 1);
    # left on the portable jnp.dot path — see header note.
    def step(t, carry):
        h, c = carry
        start = pl.multiple_of(t * B, B)                 # 8-row aligned slice
        xp = xproj_ref[pl.ds(start, B), :]               # (B, 4H) f32
        rec = jnp.dot(h.astype(jnp.bfloat16), w_hh_ref[...],   # stream w_hh
                      preferred_element_type=jnp.float32)       # (B, 4H) f32
        gates = xp + rec
        if gates_in_bf16:
            # v6e/v7x: EUP has a bf16 path at ~2x the f32 element rate and the
            # 5 transcendentals/step sit on the serial chain.  (NOT on v5e.)
            gates = gates.astype(jnp.bfloat16)
        i = jax.nn.sigmoid(gates[:, 0 * H:1 * H]).astype(jnp.float32)
        f = jax.nn.sigmoid(gates[:, 1 * H:2 * H]).astype(jnp.float32)
        g = jnp.tanh(gates[:, 2 * H:3 * H]).astype(jnp.float32)
        o = jax.nn.sigmoid(gates[:, 3 * H:4 * H]).astype(jnp.float32)
        c_new = f * c + i * g                            # state update in f32
        h_new = o * jnp.tanh(c_new)
        return h_new, c_new

    h0 = jnp.zeros((B, H), jnp.float32)
    c0 = jnp.zeros((B, H), jnp.float32)
    h_last, _ = lax.fori_loop(0, T, step, (h0, c0), unroll=True)

    # ---- 3) Final Linear(H, 1): VPU multiply + lane reduction (no N=1 MXU
    #         matmul), written as a lane-dense slab (no masked vst).
    y = jnp.sum(h_last * w_out_ref[...], axis=-1, keepdims=True) + b_out_ref[...]
    out_ref[...] = jnp.broadcast_to(y, (B, OUT_LANES))


def lstm_model_forward(x_btf, params, *, gates_in_bf16=None):
    """x_btf: (B, T, 4) float32 -> (B, 1) float32."""
    B, T, F = x_btf.shape
    H = params["w_out"].shape[1]
    B_pad = _round_up(max(B, 8), 8)  # at least one full sublane tile

    if gates_in_bf16 is None:
        kind = jax.devices()[0].device_kind.lower()
        # bf16 EUP only on v6e / v7x; keep f32 gates on v5e (and anything else).
        gates_in_bf16 = ("v6" in kind) or ("v7" in kind)

    # Single fused pad + transpose + reshape (one tiny copy; review item 6).
    x_flat = jnp.pad(
        jnp.swapaxes(x_btf.astype(jnp.float32), 0, 1),      # (T, B, F)
        ((0, 0), (0, B_pad - B), (0, 0)),
    ).reshape(T * B_pad, F)

    # All-in-VMEM design threshold (review item 7): chunk T with an 'arbitrary'
    # grid axis once xproj + w_hh approach ~half the scoped VMEM (v7x: 32 MiB
    # default scoped / 64 MiB physical — half of v5e/v6e).
    xproj_bytes = 4 * T * B_pad * 4 * H
    whh_bytes = 2 * H * 4 * H
    assert xproj_bytes + whh_bytes < 16 * 1024 * 1024, (
        "xproj scratch too large for the all-in-VMEM kernel on v7x; "
        "switch to a grid axis over T (\"arbitrary\") and chunk the projection")
    # TODO(synk): for serving-scale batches (B_pad >= 128/256) add a leading
    # batch grid axis with dimension_semantics=("parallel",) so v7x's second
    # TensorCore is engaged, and block x_flat/out/xproj by batch (items 2/3).

    kernel = functools.partial(lstm_last_linear_kernel,
                               hidden_size=H, seq_len=T, batch_pad=B_pad,
                               gates_in_bf16=gates_in_bf16)
    vmem = pl.BlockSpec(memory_space=pltpu.MemorySpace.VMEM)

    flops = int(2 * T * B_pad * F * 4 * H        # input projection
                + 2 * T * B_pad * H * 4 * H      # recurrent matmuls
                + 2 * B_pad * H)                 # final linear
    transcendentals = int(5 * T * B_pad * H)     # 3 sigmoid + 2 tanh per step
    bytes_accessed = int(
        x_flat.size * 4
        + params["w_ih_t"].size * 4
        + params["w_hh_bf16"].size * 2
        + params["bias"].size * 4
        + params["w_out"].size * 4
        + params["b_out"].size * 4
        + B_pad * OUT_LANES * 4
    )

    out_padded = pl.pallas_call(
        kernel,
        out_shape=jax.ShapeDtypeStruct((B_pad, OUT_LANES), jnp.float32),
        in_specs=[vmem] * 6,
        out_specs=vmem,
        scratch_shapes=[pltpu.VMEM((T * B_pad, 4 * H), jnp.float32)],
        compiler_params=pltpu.CompilerParams(
            # ~0.35 MiB actual footprint; 2 MiB leaves this call from hogging
            # the scoped budget when composed into a larger program (item 8).
            vmem_limit_bytes=2 * 1024 * 1024),
        cost_estimate=pl.CostEstimate(flops=flops,
                                      transcendentals=transcendentals,
                                      bytes_accessed=bytes_accessed),
    )(
        x_flat,
        params["w_ih_t"],
        params["w_hh_bf16"],
        params["bias"],
        params["w_out"],
        params["b_out"],
    )
    # Padded batch rows carry bias-only garbage state; they are sliced off here
    # and must never be reused downstream.
    return out_padded[:B, :1]


def init_params(key, hidden_size, input_size=4):
    """Deterministic init mimicking PyTorch's U(-1/sqrt(H), 1/sqrt(H))."""
    H = hidden_size
    k = 1.0 / jnp.sqrt(jnp.float32(H))
    keys = jax.random.split(key, 6)
    w_ih = jax.random.uniform(keys[0], (4 * H, input_size), jnp.float32, -k, k)
    w_hh = jax.random.uniform(keys[1], (4 * H, H), jnp.float32, -k, k)
    b_ih = jax.random.uniform(keys[2], (4 * H,), jnp.float32, -k, k)
    b_hh = jax.random.uniform(keys[3], (4 * H,), jnp.float32, -k, k)
    w_lin = jax.random.uniform(keys[4], (1, H), jnp.float32, -k, k)
    b_lin = jax.random.uniform(keys[5], (1,), jnp.float32, -k, k)
    return {
        "w_ih_t": jnp.transpose(w_ih),                          # (4, 4H)  f32
        # bf16 recurrent weight is a deliberate deviation from PyTorch's f32
        # LSTM (f32 accumulation kept); fine at T=8/H=128, revisit for long T.
        "w_hh_bf16": jnp.transpose(w_hh).astype(jnp.bfloat16),  # (H, 4H)  bf16
        "bias": (b_ih + b_hh).reshape(1, 4 * H),                # (1, 4H)  f32
        "w_out": w_lin,                                         # (1, H)   f32
        "b_out": b_lin.reshape(1, 1),                           # (1, 1)   f32
    }


def reference_forward(x_btf, params, *, gates_in_bf16):
    """Plain-JAX reference mirroring the kernel math exactly (bf16 w_hh/h
    operands with f32 accumulation, optional bf16 gate nonlinearities)."""
    B, T, F = x_btf.shape
    H = params["w_out"].shape[1]
    h = jnp.zeros((B, H), jnp.float32)
    c = jnp.zeros((B, H), jnp.float32)
    for t in range(T):
        gates = (x_btf[:, t, :] @ params["w_ih_t"] + params["bias"]
                 + jnp.dot(h.astype(jnp.bfloat16), params["w_hh_bf16"],
                           preferred_element_type=jnp.float32))
        if gates_in_bf16:
            gates = gates.astype(jnp.bfloat16)
        i = jax.nn.sigmoid(gates[:, 0 * H:1 * H]).astype(jnp.float32)
        f = jax.nn.sigmoid(gates[:, 1 * H:2 * H]).astype(jnp.float32)
        g = jnp.tanh(gates[:, 2 * H:3 * H]).astype(jnp.float32)
        o = jax.nn.sigmoid(gates[:, 3 * H:4 * H]).astype(jnp.float32)
        c = f * c + i * g
        h = o * jnp.tanh(c)
    return jnp.sum(h * params["w_out"], axis=-1, keepdims=True) + params["b_out"]


if __name__ == "__main__":
    B, T, F = 2, 8, 4
    hidden_size = 128

    key = jax.random.PRNGKey(0)
    k_x, k_p = jax.random.split(key)
    x = jax.random.normal(k_x, (B, T, F), jnp.float32)
    params = init_params(k_p, hidden_size, input_size=F)

    kind = jax.devices()[0].device_kind.lower()
    gates_in_bf16 = ("v6" in kind) or ("v7" in kind)

    out = lstm_model_forward(x, params, gates_in_bf16=gates_in_bf16)
    out = jax.block_until_ready(out)
    assert out.shape == (B, 1), out.shape

    ref = reference_forward(x, params, gates_in_bf16=gates_in_bf16)
    assert jnp.allclose(out, ref, rtol=1e-2, atol=1e-2), (out, ref)

    print("KERNEL_OK")
</pallas_src>

<mosaic_0001>
module attributes {stable_mosaic.version = 11 : i64} {
  func.func @lstm_last_linear_kernel(%arg0: memref<64x4xf32, #tpu.memory_space<vmem>>, %arg1: memref<4x512xf32, #tpu.memory_space<vmem>>, %arg2: memref<128x512xbf16, #tpu.memory_space<vmem>>, %arg3: memref<1x512xf32, #tpu.memory_space<vmem>>, %arg4: memref<1x128xf32, #tpu.memory_space<vmem>>, %arg5: memref<1x1xf32, #tpu.memory_space<vmem>>, %arg6: memref<8x128xf32, #tpu.memory_space<vmem>>, %arg7: memref<64x512xf32, #tpu.memory_space<vmem>>) attributes {dimension_semantics = [], scalar_prefetch = 0 : i64, scratch_operands = 1 : i64, tpu.core_type = #tpu.core_type<tc>} {
    %c0 = arith.constant 0 : index
    %c0_0 = arith.constant 0 : index
    %0 = vector.load %arg0[%c0, %c0_0] : memref<64x4xf32, #tpu.memory_space<vmem>>, vector<64x4xf32>
    %c0_1 = arith.constant 0 : index
    %c0_2 = arith.constant 0 : index
    %1 = vector.load %arg1[%c0_1, %c0_2] : memref<4x512xf32, #tpu.memory_space<vmem>>, vector<4x512xf32>
    %cst = arith.constant dense<0.000000e+00> : vector<64x512xf32>
    %2 = tpu.matmul %0, %1, %cst {dimension_numbers = #tpu.dot_dimension_numbers<[1], [0], [0], [1], [0, 0, 1, 1], [], []>} : vector<64x4xf32>, vector<4x512xf32>, vector<64x512xf32> -> vector<64x512xf32>
    %c0_3 = arith.constant 0 : index
    %c0_4 = arith.constant 0 : index
    %3 = vector.load %arg3[%c0_3, %c0_4] : memref<1x512xf32, #tpu.memory_space<vmem>>, vector<1x512xf32>
    %4 = vector.broadcast %3 : vector<1x512xf32> to vector<64x512xf32>
    %5 = arith.addf %2, %4 : vector<64x512xf32>
    %c0_5 = arith.constant 0 : index
    %c0_6 = arith.constant 0 : index
    %6 = vector.load %arg7[%c0_5, %c0_6] : memref<64x512xf32, #tpu.memory_space<vmem>>, vector<64x512xf32>
    tpu.vector_store %arg7[%c0_5, %c0_6], %5 {strides = array<i32>} : memref<64x512xf32, #tpu.memory_space<vmem>>, vector<64x512xf32>,
    %cst_7 = arith.constant 0.000000e+00 : f32
    %7 = vector.broadcast %cst_7 : f32 to vector<8x128xf32>
    %cst_8 = arith.constant 0.000000e+00 : f32
    %8 = vector.broadcast %cst_8 : f32 to vector<8x128xf32>
    %c0_i32 = arith.constant 0 : i32
    %c8_i32 = arith.constant 8 : i32
    %9 = arith.muli %c0_i32, %c8_i32 : i32
    %10 = tpu.assume_multiple %9, 8 : i32
    %11 = arith.index_cast %10 : i32 to index
    %c0_9 = arith.constant 0 : index
    %12 = vector.load %arg7[%11, %c0_9] : memref<64x512xf32, #tpu.memory_space<vmem>>, vector<8x512xf32>
    %13 = arith.truncf %7 : vector<8x128xf32> to vector<8x128xbf16>
    %c0_10 = arith.constant 0 : index
    %c0_11 = arith.constant 0 : index
    %14 = vector.load %arg2[%c0_10, %c0_11] : memref<128x512xbf16, #tpu.memory_space<vmem>>, vector<128x512xbf16>
    %cst_12 = arith.constant dense<0.000000e+00> : vector<8x512xf32>
    %15 = tpu.matmul %13, %14, %cst_12 {dimension_numbers = #tpu.dot_dimension_numbers<[1], [0], [0], [1], [0, 0, 1, 1], [], []>} : vector<8x128xbf16>, vector<128x512xbf16>, vector<8x512xf32> -> vector<8x512xf32>
    %16 = arith.addf %12, %15 : vector<8x512xf32>
    %17 = vector.extract_strided_slice %16 {offsets = [0, 0], sizes = [8, 128], strides = [1, 1]} : vector<8x512xf32> to vector<8x128xf32>
    %18 = arith.negf %17 : vector<8x128xf32>
    %19 = math.exp %18 : vector<8x128xf32>
    %cst_13 = arith.constant 1.000000e+00 : f32
    %20 = vector.broadcast %cst_13 : f32 to vector<8x128xf32>
    %21 = arith.addf %20, %19 : vector<8x128xf32>
    %22 = arith.divf %20, %21 : vector<8x128xf32>
    %23 = vector.extract_strided_slice %16 {offsets = [0, 128], sizes = [8, 128], strides = [1, 1]} : vector<8x512xf32> to vector<8x128xf32>
    %24 = arith.negf %23 : vector<8x128xf32>
    %25 = math.exp %24 : vector<8x128xf32>
    %cst_14 = arith.constant 1.000000e+00 : f32
    %26 = vector.broadcast %cst_14 : f32 to vector<8x128xf32>
    %27 = arith.addf %26, %25 : vector<8x128xf32>
    %28 = arith.divf %26, %27 : vector<8x128xf32>
    %29 = vector.extract_strided_slice %16 {offsets = [0, 256], sizes = [8, 128], strides = [1, 1]} : vector<8x512xf32> to vector<8x128xf32>
    %30 = math.tanh %29 : vector<8x128xf32>
    %31 = vector.extract_strided_slice %16 {offsets = [0, 384], sizes = [8, 128], strides = [1, 1]} : vector<8x512xf32> to vector<8x128xf32>
    %32 = arith.negf %31 : vector<8x128xf32>
    %33 = math.exp %32 : vector<8x128xf32>
    %cst_15 = arith.constant 1.000000e+00 : f32
    %34 = vector.broadcast %cst_15 : f32 to vector<8x128xf32>
    %35 = arith.addf %34, %33 : vector<8x128xf32>
    %36 = arith.divf %34, %35 : vector<8x128xf32>
    %37 = arith.mulf %28, %8 : vector<8x128xf32>
    %38 = arith.mulf %22, %30 : vector<8x128xf32>
    %39 = arith.addf %37, %38 : vector<8x128xf32>
    %40 = math.tanh %39 : vector<8x128xf32>
    %41 = arith.mulf %36, %40 : vector<8x128xf32>
    %c1_i32 = arith.constant 1 : i32
    %c8_i32_16 = arith.constant 8 : i32
    %42 = arith.muli %c1_i32, %c8_i32_16 : i32
    %43 = tpu.assume_multiple %42, 8 : i32
    %44 = arith.index_cast %43 : i32 to index
    %c0_17 = arith.constant 0 : index
    %45 = vector.load %arg7[%44, %c0_17] : memref<64x512xf32, #tpu.memory_space<vmem>>, vector<8x512xf32>
    %46 = arith.truncf %41 : vector<8x128xf32> to vector<8x128xbf16>
    %c0_18 = arith.constant 0 : index
    %c0_19 = arith.constant 0 : index
    %47 = vector.load %arg2[%c0_18, %c0_19] : memref<128x512xbf16, #tpu.memory_space<vmem>>, vector<128x512xbf16>
    %cst_20 = arith.constant dense<0.000000e+00> : vector<8x512xf32>
    %48 = tpu.matmul %46, %47, %cst_20 {dimension_numbers = #tpu.dot_dimension_numbers<[1], [0], [0], [1], [0, 0, 1, 1], [], []>} : vector<8x128xbf16>, vector<128x512xbf16>, vector<8x512xf32> -> vector<8x512xf32>
    %49 = arith.addf %45, %48 : vector<8x512xf32>
    %50 = vector.extract_strided_slice %49 {offsets = [0, 0], sizes = [8, 128], strides = [1, 1]} : vector<8x512xf32> to vector<8x128xf32>
    %51 = arith.negf %50 : vector<8x128xf32>
    %52 = math.exp %51 : vector<8x128xf32>
    %cst_21 = arith.constant 1.000000e+00 : f32
    %53 = vector.broadcast %cst_21 : f32 to vector<8x128xf32>
    %54 = arith.addf %53, %52 : vector<8x128xf32>
    %55 = arith.divf %53, %54 : vector<8x128xf32>
    %56 = vector.extract_strided_slice %49 {offsets = [0, 128], sizes = [8, 128], strides = [1, 1]} : vector<8x512xf32> to vector<8x128xf32>
    %57 = arith.negf %56 : vector<8x128xf32>
    %58 = math.exp %57 : vector<8x128xf32>
    %cst_22 = arith.constant 1.000000e+00 : f32
    %59 = vector.broadcast %cst_22 : f32 to vector<8x128xf32>
    %60 = arith.addf %59, %58 : vector<8x128xf32>
    %61 = arith.divf %59, %60 : vector<8x128xf32>
    %62 = vector.extract_strided_slice %49 {offsets = [0, 256], sizes = [8, 128], strides = [1, 1]} : vector<8x512xf32> to vector<8x128xf32>
    %63 = math.tanh %62 : vector<8x128xf32>
    %64 = vector.extract_strided_slice %49 {offsets = [0, 384], sizes = [8, 128], strides = [1, 1]} : vector<8x512xf32> to vector<8x128xf32>
    %65 = arith.negf %64 : vector<8x128xf32>
    %66 = math.exp %65 : vector<8x128xf32>
    %cst_23 = arith.constant 1.000000e+00 : f32
    %67 = vector.broadcast %cst_23 : f32 to vector<8x128xf32>
    %68 = arith.addf %67, %66 : vector<8x128xf32>
    %69 = arith.divf %67, %68 : vector<8x128xf32>
    %70 = arith.mulf %61, %39 : vector<8x128xf32>
    %71 = arith.mulf %55, %63 : vector<8x128xf32>
    %72 = arith.addf %70, %71 : vector<8x128xf32>
    %73 = math.tanh %72 : vector<8x128xf32>
    %74 = arith.mulf %69, %73 : vector<8x128xf32>
    %c2_i32 = arith.constant 2 : i32
    %c8_i32_24 = arith.constant 8 : i32
    %75 = arith.muli %c2_i32, %c8_i32_24 : i32
    %76 = tpu.assume_multiple %75, 8 : i32
    %77 = arith.index_cast %76 : i32 to index
    %c0_25 = arith.constant 0 : index
    %78 = vector.load %arg7[%77, %c0_25] : memref<64x512xf32, #tpu.memory_space<vmem>>, vector<8x512xf32>
    %79 = arith.truncf %74 : vector<8x128xf32> to vector<8x128xbf16>
    %c0_26 = arith.constant 0 : index
    %c0_27 = arith.constant 0 : index
    %80 = vector.load %arg2[%c0_26, %c0_27] : memref<128x512xbf16, #tpu.memory_space<vmem>>, vector<128x512xbf16>
    %cst_28 = arith.constant dense<0.000000e+00> : vector<8x512xf32>
    %81 = tpu.matmul %79, %80, %cst_28 {dimension_numbers = #tpu.dot_dimension_numbers<[1], [0], [0], [1], [0, 0, 1, 1], [], []>} : vector<8x128xbf16>, vector<128x512xbf16>, vector<8x512xf32> -> vector<8x512xf32>
    %82 = arith.addf %78, %81 : vector<8x512xf32>
    %83 = vector.extract_strided_slice %82 {offsets = [0, 0], sizes = [8, 128], strides = [1, 1]} : vector<8x512xf32> to vector<8x128xf32>
    %84 = arith.negf %83 : vector<8x128xf32>
    %85 = math.exp %84 : vector<8x128xf32>
    %cst_29 = arith.constant 1.000000e+00 : f32
    %86 = vector.broadcast %cst_29 : f32 to vector<8x128xf32>
    %87 = arith.addf %86, %85 : vector<8x128xf32>
    %88 = arith.divf %86, %87 : vector<8x128xf32>
    %89 = vector.extract_strided_slice %82 {offsets = [0, 128], sizes = [8, 128], strides = [1, 1]} : vector<8x512xf32> to vector<8x128xf32>
    %90 = arith.negf %89 : vector<8x128xf32>
    %91 = math.exp %90 : vector<8x128xf32>
    %cst_30 = arith.constant 1.000000e+00 : f32
    %92 = vector.broadcast %cst_30 : f32 to vector<8x128xf32>
    %93 = arith.addf %92, %91 : vector<8x128xf32>
    %94 = arith.divf %92, %93 : vector<8x128xf32>
    %95 = vector.extract_strided_slice %82 {offsets = [0, 256], sizes = [8, 128], strides = [1, 1]} : vector<8x512xf32> to vector<8x128xf32>
    %96 = math.tanh %95 : vector<8x128xf32>
    %97 = vector.extract_strided_slice %82 {offsets = [0, 384], sizes = [8, 128], strides = [1, 1]} : vector<8x512xf32> to vector<8x128xf32>
    %98 = arith.negf %97 : vector<8x128xf32>
    %99 = math.exp %98 : vector<8x128xf32>
    %cst_31 = arith.constant 1.000000e+00 : f32
    %100 = vector.broadcast %cst_31 : f32 to vector<8x128xf32>
    %101 = arith.addf %100, %99 : vector<8x128xf32>
    %102 = arith.divf %100, %101 : vector<8x128xf32>
    %103 = arith.mulf %94, %72 : vector<8x128xf32>
    %104 = arith.mulf %88, %96 : vector<8x128xf32>
    %105 = arith.addf %103, %104 : vector<8x128xf32>
    %106 = math.tanh %105 : vector<8x128xf32>
    %107 = arith.mulf %102, %106 : vector<8x128xf32>
    %c3_i32 = arith.constant 3 : i32
    %c8_i32_32 = arith.constant 8 : i32
    %108 = arith.muli %c3_i32, %c8_i32_32 : i32
    %109 = tpu.assume_multiple %108, 8 : i32
    %110 = arith.index_cast %109 : i32 to index
    %c0_33 = arith.constant 0 : index
    %111 = vector.load %arg7[%110, %c0_33] : memref<64x512xf32, #tpu.memory_space<vmem>>, vector<8x512xf32>
    %112 = arith.truncf %107 : vector<8x128xf32> to vector<8x128xbf16>
    %c0_34 = arith.constant 0 : index
    %c0_35 = arith.constant 0 : index
    %113 = vector.load %arg2[%c0_34, %c0_35] : memref<128x512xbf16, #tpu.memory_space<vmem>>, vector<128x512xbf16>
    %cst_36 = arith.constant dense<0.000000e+00> : vector<8x512xf32>
    %114 = tpu.matmul %112, %113, %cst_36 {dimension_numbers = #tpu.dot_dimension_numbers<[1], [0], [0], [1], [0, 0, 1, 1], [], []>} : vector<8x128xbf16>, vector<128x512xbf16>, vector<8x512xf32> -> vector<8x512xf32>
    %115 = arith.addf %111, %114 : vector<8x512xf32>
    %116 = vector.extract_strided_slice %115 {offsets = [0, 0], sizes = [8, 128], strides = [1, 1]} : vector<8x512xf32> to vector<8x128xf32>
    %117 = arith.negf %116 : vector<8x128xf32>
    %118 = math.exp %117 : vector<8x128xf32>
    %cst_37 = arith.constant 1.000000e+00 : f32
    %119 = vector.broadcast %cst_37 : f32 to vector<8x128xf32>
    %120 = arith.addf %119, %118 : vector<8x128xf32>
    %121 = arith.divf %119, %120 : vector<8x128xf32>
    %122 = vector.extract_strided_slice %115 {offsets = [0, 128], sizes = [8, 128], strides = [1, 1]} : vector<8x512xf32> to vector<8x128xf32>
    %123 = arith.negf %122 : vector<8x128xf32>
    %124 = math.exp %123 : vector<8x128xf32>
    %cst_38 = arith.constant 1.000000e+00 : f32
    %125 = vector.broadcast %cst_38 : f32 to vector<8x128xf32>
    %126 = arith.addf %125, %124 : vector<8x128xf32>
    %127 = arith.divf %125, %126 : vector<8x128xf32>
    %128 = vector.extract_strided_slice %115 {offsets = [0, 256], sizes = [8, 128], strides = [1, 1]} : vector<8x512xf32> to vector<8x128xf32>
    %129 = math.tanh %128 : vector<8x128xf32>
    %130 = vector.extract_strided_slice %115 {offsets = [0, 384], sizes = [8, 128], strides = [1, 1]} : vector<8x512xf32> to vector<8x128xf32>
    %131 = arith.negf %130 : vector<8x128xf32>
    %132 = math.exp %131 : vector<8x128xf32>
    %cst_39 = arith.constant 1.000000e+00 : f32
    %133 = vector.broadcast %cst_39 : f32 to vector<8x128xf32>
    %134 = arith.addf %133, %132 : vector<8x128xf32>
    %135 = arith.divf %133, %134 : vector<8x128xf32>
    %136 = arith.mulf %127, %105 : vector<8x128xf32>
    %137 = arith.mulf %121, %129 : vector<8x128xf32>
    %138 = arith.addf %136, %137 : vector<8x128xf32>
    %139 = math.tanh %138 : vector<8x128xf32>
    %140 = arith.mulf %135, %139 : vector<8x128xf32>
    %c4_i32 = arith.constant 4 : i32
    %c8_i32_40 = arith.constant 8 : i32
    %141 = arith.muli %c4_i32, %c8_i32_40 : i32
    %142 = tpu.assume_multiple %141, 8 : i32
    %143 = arith.index_cast %142 : i32 to index
    %c0_41 = arith.constant 0 : index
    %144 = vector.load %arg7[%143, %c0_41] : memref<64x512xf32, #tpu.memory_space<vmem>>, vector<8x512xf32>
    %145 = arith.truncf %140 : vector<8x128xf32> to vector<8x128xbf16>
    %c0_42 = arith.constant 0 : index
    %c0_43 = arith.constant 0 : index
    %146 = vector.load %arg2[%c0_42, %c0_43] : memref<128x512xbf16, #tpu.memory_space<vmem>>, vector<128x512xbf16>
    %cst_44 = arith.constant dense<0.000000e+00> : vector<8x512xf32>
    %147 = tpu.matmul %145, %146, %cst_44 {dimension_numbers = #tpu.dot_dimension_numbers<[1], [0], [0], [1], [0, 0, 1, 1], [], []>} : vector<8x128xbf16>, vector<128x512xbf16>, vector<8x512xf32> -> vector<8x512xf32>
    %148 = arith.addf %144, %147 : vector<8x512xf32>
    %149 = vector.extract_strided_slice %148 {offsets = [0, 0], sizes = [8, 128], strides = [1, 1]} : vector<8x512xf32> to vector<8x128xf32>
    %150 = arith.negf %149 : vector<8x128xf32>
    %151 = math.exp %150 : vector<8x128xf32>
    %cst_45 = arith.constant 1.000000e+00 : f32
    %152 = vector.broadcast %cst_45 : f32 to vector<8x128xf32>
    %153 = arith.addf %152, %151 : vector<8x128xf32>
    %154 = arith.divf %152, %153 : vector<8x128xf32>
    %155 = vector.extract_strided_slice %148 {offsets = [0, 128], sizes = [8, 128], strides = [1, 1]} : vector<8x512xf32> to vector<8x128xf32>
    %156 = arith.negf %155 : vector<8x128xf32>
    %157 = math.exp %156 : vector<8x128xf32>
    %cst_46 = arith.constant 1.000000e+00 : f32
    %158 = vector.broadcast %cst_46 : f32 to vector<8x128xf32>
    %159 = arith.addf %158, %157 : vector<8x128xf32>
    %160 = arith.divf %158, %159 : vector<8x128xf32>
    %161 = vector.extract_strided_slice %148 {offsets = [0, 256], sizes = [8, 128], strides = [1, 1]} : vector<8x512xf32> to vector<8x128xf32>
    %162 = math.tanh %161 : vector<8x128xf32>
    %163 = vector.extract_strided_slice %148 {offsets = [0, 384], sizes = [8, 128], strides = [1, 1]} : vector<8x512xf32> to vector<8x128xf32>
    %164 = arith.negf %163 : vector<8x128xf32>
    %165 = math.exp %164 : vector<8x128xf32>
    %cst_47 = arith.constant 1.000000e+00 : f32
    %166 = vector.broadcast %cst_47 : f32 to vector<8x128xf32>
    %167 = arith.addf %166, %165 : vector<8x128xf32>
    %168 = arith.divf %166, %167 : vector<8x128xf32>
    %169 = arith.mulf %160, %138 : vector<8x128xf32>
    %170 = arith.mulf %154, %162 : vector<8x128xf32>
    %171 = arith.addf %169, %170 : vector<8x128xf32>
    %172 = math.tanh %171 : vector<8x128xf32>
    %173 = arith.mulf %168, %172 : vector<8x128xf32>
    %c5_i32 = arith.constant 5 : i32
    %c8_i32_48 = arith.constant 8 : i32
    %174 = arith.muli %c5_i32, %c8_i32_48 : i32
    %175 = tpu.assume_multiple %174, 8 : i32
    %176 = arith.index_cast %175 : i32 to index
    %c0_49 = arith.constant 0 : index
    %177 = vector.load %arg7[%176, %c0_49] : memref<64x512xf32, #tpu.memory_space<vmem>>, vector<8x512xf32>
    %178 = arith.truncf %173 : vector<8x128xf32> to vector<8x128xbf16>
    %c0_50 = arith.constant 0 : index
    %c0_51 = arith.constant 0 : index
    %179 = vector.load %arg2[%c0_50, %c0_51] : memref<128x512xbf16, #tpu.memory_space<vmem>>, vector<128x512xbf16>
    %cst_52 = arith.constant dense<0.000000e+00> : vector<8x512xf32>
    %180 = tpu.matmul %178, %179, %cst_52 {dimension_numbers = #tpu.dot_dimension_numbers<[1], [0], [0], [1], [0, 0, 1, 1], [], []>} : vector<8x128xbf16>, vector<128x512xbf16>, vector<8x512xf32> -> vector<8x512xf32>
    %181 = arith.addf %177, %180 : vector<8x512xf32>
    %182 = vector.extract_strided_slice %181 {offsets = [0, 0], sizes = [8, 128], strides = [1, 1]} : vector<8x512xf32> to vector<8x128xf32>
    %183 = arith.negf %182 : vector<8x128xf32>
    %184 = math.exp %183 : vector<8x128xf32>
    %cst_53 = arith.constant 1.000000e+00 : f32
    %185 = vector.broadcast %cst_53 : f32 to vector<8x128xf32>
    %186 = arith.addf %185, %184 : vector<8x128xf32>
    %187 = arith.divf %185, %186 : vector<8x128xf32>
    %188 = vector.extract_strided_slice %181 {offsets = [0, 128], sizes = [8, 128], strides = [1, 1]} : vector<8x512xf32> to vector<8x128xf32>
    %189 = arith.negf %188 : vector<8x128xf32>
    %190 = math.exp %189 : vector<8x128xf32>
    %cst_54 = arith.constant 1.000000e+00 : f32
    %191 = vector.broadcast %cst_54 : f32 to vector<8x128xf32>
    %192 = arith.addf %191, %190 : vector<8x128xf32>
    %193 = arith.divf %191, %192 : vector<8x128xf32>
    %194 = vector.extract_strided_slice %181 {offsets = [0, 256], sizes = [8, 128], strides = [1, 1]} : vector<8x512xf32> to vector<8x128xf32>
    %195 = math.tanh %194 : vector<8x128xf32>
    %196 = vector.extract_strided_slice %181 {offsets = [0, 384], sizes = [8, 128], strides = [1, 1]} : vector<8x512xf32> to vector<8x128xf32>
    %197 = arith.negf %196 : vector<8x128xf32>
    %198 = math.exp %197 : vector<8x128xf32>
    %cst_55 = arith.constant 1.000000e+00 : f32
    %199 = vector.broadcast %cst_55 : f32 to vector<8x128xf32>
    %200 = arith.addf %199, %198 : vector<8x128xf32>
    %201 = arith.divf %199, %200 : vector<8x128xf32>
    %202 = arith.mulf %193, %171 : vector<8x128xf32>
    %203 = arith.mulf %187, %195 : vector<8x128xf32>
    %204 = arith.addf %202, %203 : vector<8x128xf32>
    %205 = math.tanh %204 : vector<8x128xf32>
    %206 = arith.mulf %201, %205 : vector<8x128xf32>
    %c6_i32 = arith.constant 6 : i32
    %c8_i32_56 = arith.constant 8 : i32
    %207 = arith.muli %c6_i32, %c8_i32_56 : i32
    %208 = tpu.assume_multiple %207, 8 : i32
    %209 = arith.index_cast %208 : i32 to index
    %c0_57 = arith.constant 0 : index
    %210 = vector.load %arg7[%209, %c0_57] : memref<64x512xf32, #tpu.memory_space<vmem>>, vector<8x512xf32>
    %211 = arith.truncf %206 : vector<8x128xf32> to vector<8x128xbf16>
    %c0_58 = arith.constant 0 : index
    %c0_59 = arith.constant 0 : index
    %212 = vector.load %arg2[%c0_58, %c0_59] : memref<128x512xbf16, #tpu.memory_space<vmem>>, vector<128x512xbf16>
    %cst_60 = arith.constant dense<0.000000e+00> : vector<8x512xf32>
    %213 = tpu.matmul %211, %212, %cst_60 {dimension_numbers = #tpu.dot_dimension_numbers<[1], [0], [0], [1], [0, 0, 1, 1], [], []>} : vector<8x128xbf16>, vector<128x512xbf16>, vector<8x512xf32> -> vector<8x512xf32>
    %214 = arith.addf %210, %213 : vector<8x512xf32>
    %215 = vector.extract_strided_slice %214 {offsets = [0, 0], sizes = [8, 128], strides = [1, 1]} : vector<8x512xf32> to vector<8x128xf32>
    %216 = arith.negf %215 : vector<8x128xf32>
    %217 = math.exp %216 : vector<8x128xf32>
    %cst_61 = arith.constant 1.000000e+00 : f32
    %218 = vector.broadcast %cst_61 : f32 to vector<8x128xf32>
    %219 = arith.addf %218, %217 : vector<8x128xf32>
    %220 = arith.divf %218, %219 : vector<8x128xf32>
    %221 = vector.extract_strided_slice %214 {offsets = [0, 128], sizes = [8, 128], strides = [1, 1]} : vector<8x512xf32> to vector<8x128xf32>
    %222 = arith.negf %221 : vector<8x128xf32>
    %223 = math.exp %222 : vector<8x128xf32>
    %cst_62 = arith.constant 1.000000e+00 : f32
    %224 = vector.broadcast %cst_62 : f32 to vector<8x128xf32>
    %225 = arith.addf %224, %223 : vector<8x128xf32>
    %226 = arith.divf %224, %225 : vector<8x128xf32>
    %227 = vector.extract_strided_slice %214 {offsets = [0, 256], sizes = [8, 128], strides = [1, 1]} : vector<8x512xf32> to vector<8x128xf32>
    %228 = math.tanh %227 : vector<8x128xf32>
    %229 = vector.extract_strided_slice %214 {offsets = [0, 384], sizes = [8, 128], strides = [1, 1]} : vector<8x512xf32> to vector<8x128xf32>
    %230 = arith.negf %229 : vector<8x128xf32>
    %231 = math.exp %230 : vector<8x128xf32>
    %cst_63 = arith.constant 1.000000e+00 : f32
    %232 = vector.broadcast %cst_63 : f32 to vector<8x128xf32>
    %233 = arith.addf %232, %231 : vector<8x128xf32>
    %234 = arith.divf %232, %233 : vector<8x128xf32>
    %235 = arith.mulf %226, %204 : vector<8x128xf32>
    %236 = arith.mulf %220, %228 : vector<8x128xf32>
    %237 = arith.addf %235, %236 : vector<8x128xf32>
    %238 = math.tanh %237 : vector<8x128xf32>
    %239 = arith.mulf %234, %238 : vector<8x128xf32>
    %c7_i32 = arith.constant 7 : i32
    %c8_i32_64 = arith.constant 8 : i32
    %240 = arith.muli %c7_i32, %c8_i32_64 : i32
    %241 = tpu.assume_multiple %240, 8 : i32
    %242 = arith.index_cast %241 : i32 to index
    %c0_65 = arith.constant 0 : index
    %243 = vector.load %arg7[%242, %c0_65] : memref<64x512xf32, #tpu.memory_space<vmem>>, vector<8x512xf32>
    %244 = arith.truncf %239 : vector<8x128xf32> to vector<8x128xbf16>
    %c0_66 = arith.constant 0 : index
    %c0_67 = arith.constant 0 : index
    %245 = vector.load %arg2[%c0_66, %c0_67] : memref<128x512xbf16, #tpu.memory_space<vmem>>, vector<128x512xbf16>
    %cst_68 = arith.constant dense<0.000000e+00> : vector<8x512xf32>
    %246 = tpu.matmul %244, %245, %cst_68 {dimension_numbers = #tpu.dot_dimension_numbers<[1], [0], [0], [1], [0, 0, 1, 1], [], []>} : vector<8x128xbf16>, vector<128x512xbf16>, vector<8x512xf32> -> vector<8x512xf32>
    %247 = arith.addf %243, %246 : vector<8x512xf32>
    %248 = vector.extract_strided_slice %247 {offsets = [0, 0], sizes = [8, 128], strides = [1, 1]} : vector<8x512xf32> to vector<8x128xf32>
    %249 = arith.negf %248 : vector<8x128xf32>
    %250 = math.exp %249 : vector<8x128xf32>
    %cst_69 = arith.constant 1.000000e+00 : f32
    %251 = vector.broadcast %cst_69 : f32 to vector<8x128xf32>
    %252 = arith.addf %251, %250 : vector<8x128xf32>
    %253 = arith.divf %251, %252 : vector<8x128xf32>
    %254 = vector.extract_strided_slice %247 {offsets = [0, 128], sizes = [8, 128], strides = [1, 1]} : vector<8x512xf32> to vector<8x128xf32>
    %255 = arith.negf %254 : vector<8x128xf32>
    %256 = math.exp %255 : vector<8x128xf32>
    %cst_70 = arith.constant 1.000000e+00 : f32
    %257 = vector.broadcast %cst_70 : f32 to vector<8x128xf32>
    %258 = arith.addf %257, %256 : vector<8x128xf32>
    %259 = arith.divf %257, %258 : vector<8x128xf32>
    %260 = vector.extract_strided_slice %247 {offsets = [0, 256], sizes = [8, 128], strides = [1, 1]} : vector<8x512xf32> to vector<8x128xf32>
    %261 = math.tanh %260 : vector<8x128xf32>
    %262 = vector.extract_strided_slice %247 {offsets = [0, 384], sizes = [8, 128], strides = [1, 1]} : vector<8x512xf32> to vector<8x128xf32>
    %263 = arith.negf %262 : vector<8x128xf32>
    %264 = math.exp %263 : vector<8x128xf32>
    %cst_71 = arith.constant 1.000000e+00 : f32
    %265 = vector.broadcast %cst_71 : f32 to vector<8x128xf32>
    %266 = arith.addf %265, %264 : vector<8x128xf32>
    %267 = arith.divf %265, %266 : vector<8x128xf32>
    %268 = arith.mulf %259, %237 : vector<8x128xf32>
    %269 = arith.mulf %253, %261 : vector<8x128xf32>
    %270 = arith.addf %268, %269 : vector<8x128xf32>
    %271 = math.tanh %270 : vector<8x128xf32>
    %272 = arith.mulf %267, %271 : vector<8x128xf32>
    %c8_i32_72 = arith.constant 8 : i32
    %c0_73 = arith.constant 0 : index
    %c0_74 = arith.constant 0 : index
    %273 = vector.load %arg4[%c0_73, %c0_74] : memref<1x128xf32, #tpu.memory_space<vmem>>, vector<1x128xf32>
    %274 = vector.broadcast %273 : vector<1x128xf32> to vector<8x128xf32>
    %275 = arith.mulf %272, %274 : vector<8x128xf32>
    %cst_75 = arith.constant dense<0.000000e+00> : vector<8xf32>
    %276 = vector.multi_reduction <add>, %275, %cst_75 [1] : vector<8x128xf32> to vector<8xf32>
    %277 = vector.shape_cast %276 : vector<8xf32> to vector<8x1xf32>
    %c0_76 = arith.constant 0 : index
    %c0_77 = arith.constant 0 : index
    %278 = vector.load %arg5[%c0_76, %c0_77] : memref<1x1xf32, #tpu.memory_space<vmem>>, vector<1x1xf32>
    %279 = vector.broadcast %278 : vector<1x1xf32> to vector<8x1xf32>
    %280 = arith.addf %277, %279 : vector<8x1xf32>
    %281 = vector.shape_cast %280 : vector<8x1xf32> to vector<8x1xf32>
    %282 = vector.broadcast %281 : vector<8x1xf32> to vector<8x128xf32>
    %c0_78 = arith.constant 0 : index
    %c0_79 = arith.constant 0 : index
    %283 = vector.load %arg6[%c0_78, %c0_79] : memref<8x128xf32, #tpu.memory_space<vmem>>, vector<8x128xf32>
    tpu.vector_store %arg6[%c0_78, %c0_79], %282 {strides = array<i32>} : memref<8x128xf32, #tpu.memory_space<vmem>>, vector<8x128xf32>,
    return
  }
}

</mosaic_0001>

<bundles_post_ra>
// kernel: tpu_custom_call.1
= control target key start
LH: loop header
LB: loop body
LE: loop exit
PB: predicated region body
PF: predicated region fallthrough
CT: control target
= control target key end

     0   :  { %s2528_s0 = inlined_call_operand.vmem [shape: f32[64,4], index: 0, kind: input, shape index: {}]   ;;  %s2529_s1 = inlined_call_operand.vmem [shape: f32[4,512], index: 1, kind: input, shape index: {}]   ;;  %s2530_s2 = inlined_call_operand.hbm [shape: bf16[128,512], index: 2, kind: input, shape index: {}]   ;;  %s2531_s3 = inlined_call_operand.vmem [shape: f32[1,512], index: 3, kind: input, shape index: {}]   ;;  %s2532_s4 = inlined_call_operand.vmem [shape: f32[1,128], index: 4, kind: input, shape index: {}]   ;;  %s2533_s5 = inlined_call_operand.<no memory space> [shape: f32[1,1], index: 5, kind: input, shape index: {}]   ;;  %s2534_s6 = inlined_call_operand.hbm [shape: f32[8,128], index: 6, kind: output, shape index: {}]  }
   0x1   :  { %v11_v0 = vstv %s2533_s5 }
   0x2   :  { %12 = vst [vmem:[#allocation3] sm:$0x1] %v11_v0 }
   0x3   :  { %13 = vsyncpa [#allocation5], 0 }
   0x4   :  { %14 = vsyncpa [#allocation6], 0  ;;  %s1893_s23 = smov [#allocation4]   ;;  %s1845_s27 = scalar_lea.hbm %s2530_s2, 4096 }
   0x5   :  { %s24_s24 = sshll.u32 %s1893_s23, 4  ;;  %p1846_p0 = scmp.ne.s32.totalorder %s2530_s2, %s1845_s27  ;;  %s25_s24 = int_to_ptr.vmem [resolvable:$true] %s24_s24 }
   0x6   :  { %p1849_p1 = scmp.lt.u32.totalorder %s1845_s27, %s2530_s2 }
   0x8   :  { %p1851_p2 = pnand %p1849_p1, %p1846_p0 }
   0xa   :  { %1854 = shalt.err (!%p1851_p2)
}
   0xb   :  { %s1855_s5 = scalar_lea.vmem %s25_s24, 4096  ;;  %p1860_p4 = scmp.lt.s32.totalorder %s25_s24, %s25_s24 }
   0xc   :  { %p1856_p3 = scmp.ne.s32.totalorder %s25_s24, %s1855_s5  ;;  %p1861_p5 = scmp.lt.s32.totalorder %s1855_s5, %s1855_s5 }
   0xe   :  { %p1862_p6 = por %p1861_p5, %p1860_p4 }
  0x10   :  { %p1863_p7 = pnand %p1862_p6, %p1856_p3 }
  0x12   :  { %1866 = shalt.err (!%p1863_p7)
}
  0x13   :  { %s1894_s8 = smov 256   ;;  %s1895_s9 = smov 16  }
  0x14   :  { %30 = dma.hbm_to_vmem [thread:$0]  %s2530_s2, 4096, %s25_s24, [#allocation5], %s1894_s8, %s1894_s8, %s1895_s9  }
  0x15   :  { %1889 = dma.done.wait [#allocation5], 4096  }
  0x16   :  { %1890 = vsyncadd [#allocation5], 4294963200  ;;  %v1896_v1 = vmov 0.0   ;;  %v2535_v2 = vmov 0   ;;  %v49_v3 = vld [vmem:[%s2529_s1] sm:$0xff]  ;;  %vm102_vm0 = vcmask 1043456   ;;  %v53_v47 = vlaneseq }
  0x17   :  { %175 = vmatprep.mubr.f32.mxu0 %v1896_v1  ;;  %288 = vmatprep.mubr.f32.mxu1 %v1896_v1  ;;  %v50_v4 = vld [vmem:[%s2529_s1 + $0x8] sm:$0xff]  ;;  %v41_v5 = vld [vmem:[%s2528_s0] sm:$0xff]  ;;  %v75_v6 = vcombine.high %v49_v3, %v49_v3  ;;  %vm77_vm1 = vcmask 31744   ;;  %v43_v17 = vld [vmem:[%s2528_s0 + $0x10] sm:$0xff]  ;;  %s1898_s5 = smov [#allocation7]  }
  0x18   :  { %1634 = vset.pattern.permute.xlu0 %v2535_v2  ;;  %v76_v7 = vcombine.high %v50_v4, %v50_v4  ;;  %v1961_v8 = vld [vmem:[#allocation4 + $0x4] ss:$16 sps:$4 sm:$0xff]   ;;  %v1963_v9 = vld [vmem:[#allocation4 + $0xc] ss:$16 sps:$4 sm:$0xff]   ;;  %v1965_v10 = vld [vmem:[#allocation4] ss:$16 sps:$4 sm:$0xff]  }
  0x19   :  { %1550 = vmatprep.subr.msk.mxu0 %vm102_vm0, %v75_v6  ;;  %v1967_v11 = vld [vmem:[#allocation4 + $0x8] ss:$16 sps:$4 sm:$0xff]   ;;  %v1976_v13 = vld [vmem:[#allocation4 + $0x24] ss:$16 sps:$4 sm:$0xff]   ;;  %v1978_v14 = vld [vmem:[#allocation4 + $0x2c] ss:$16 sps:$4 sm:$0xff]  }
  0x1a   :  { %1560 = vmatprep.subr.msk.mxu1 %vm102_vm0, %v76_v7  ;;  %1551 = vmatpush1.msk.msra.mxu0 %vm102_vm0, %v49_v3  ;;  %v42_v12 = vld [vmem:[%s2528_s0 + $0x8] sm:$0xff]  ;;  %v1980_v15 = vld [vmem:[#allocation4 + $0x20] ss:$16 sps:$4 sm:$0xff]   ;;  %v44_v22 = vld [vmem:[%s2528_s0 + $0x18] sm:$0xff]  ;;  %v54_v48 = vshrl.u32 %v53_v47, 7  ;;  %s1534_s8 = sshll.u32 %s1898_s5, 4  ;;  %s1535_s8 = int_to_ptr.vmem [resolvable:$true] %s1534_s8 }
  0x1b   :  { %1561 = vmatpush1.msk.msra.mxu1 %vm102_vm0, %v50_v4  ;;  %1552 = vmatmul.mubr.msk.f32.vlgmr.msra.gmra.mrb[0].mxu0 %vm77_vm1, %v41_v5  ;;  %v1984_v16 = vld [vmem:[#allocation4 + $0x28] ss:$16 sps:$4 sm:$0xff]   ;;  %v1993_v18 = vld [vmem:[#allocation4 + $0x44] ss:$16 sps:$4 sm:$0xff]   ;;  %v1995_v19 = vld [vmem:[#allocation4 + $0x4c] ss:$16 sps:$4 sm:$0xff]   ;;  %p1872_p9 = scmp.lt.s32.totalorder %s1535_s8, %s1535_s8 }
  0x1c   :  { %1562 = vmatmul.mubr.msk.f32.vlgmr.msra.gmra.mrb[0].mxu1 %vm77_vm1, %v41_v5  ;;  %568 = vmatprep.subr.bf16.mxu0 %v1961_v8  ;;  %v1999_v20 = vld [vmem:[#allocation4 + $0x40] ss:$16 sps:$4 sm:$0xff]   ;;  %v2003_v21 = vld [vmem:[#allocation4 + $0x48] ss:$16 sps:$4 sm:$0xff]   ;;  %v2012_v23 = vld [vmem:[#allocation4 + $0x64] ss:$16 sps:$4 sm:$0xff]  }
  0x1d   :  { %609 = vmatprep.subr.bf16.mxu1 %v1963_v9  ;;  %569 = vmatpush1.bf16.msra.mxu0 %v1965_v10  ;;  %v2016_v24 = vld [vmem:[#allocation4 + $0x6c] ss:$16 sps:$4 sm:$0xff]   ;;  %v2020_v25 = vld [vmem:[#allocation4 + $0x60] ss:$16 sps:$4 sm:$0xff]   ;;  %v2022_v26 = vld [vmem:[#allocation4 + $0x68] ss:$16 sps:$4 sm:$0xff]  }
  0x1e   :  { %610 = vmatpush1.bf16.msra.mxu1 %v1967_v11  ;;  %181 = vmatprep.mubr.f32.mxu0 %v1896_v1  ;;  %v45_v27 = vld [vmem:[%s2528_s0 + $0x20] sm:$0xff]  ;;  %v2041_v31 = vld [vmem:[#allocation4 + $0x88] ss:$16 sps:$4 sm:$0xff]   ;;  %v47_v37 = vld [vmem:[%s2528_s0 + $0x30] sm:$0xff]  ;;  %v55_v49 = vsub.s32 0, %v54_v48  ;;  %v63_v50 = vsub.s32 2, %v54_v48 }
  0x1f   :  { %294 = vmatprep.mubr.f32.mxu1 %v1896_v1  ;;  %1553 = vmatmul.mubr.msk.f32.gmra.mrb[2].mxu0 %vm77_vm1, %v42_v12  ;;  %v2033_v28 = vld [vmem:[#allocation4 + $0x84] ss:$16 sps:$4 sm:$0xff]   ;;  %v2035_v29 = vld [vmem:[#allocation4 + $0x8c] ss:$16 sps:$4 sm:$0xff]   ;;  %v2037_v30 = vld [vmem:[#allocation4 + $0x80] ss:$16 sps:$4 sm:$0xff]  }
  0x20   :  { %1563 = vmatmul.mubr.msk.f32.gmra.mrb[2].mxu1 %vm77_vm1, %v42_v12  ;;  %570 = vmatprep.subr.bf16.mxu0 %v1976_v13  ;;  %v46_v32 = vld [vmem:[%s2528_s0 + $0x28] sm:$0xff]  ;;  %v2056_v35 = vld [vmem:[#allocation4 + $0xa0] ss:$16 sps:$4 sm:$0xff]   ;;  %v48_v42 = vld [vmem:[%s2528_s0 + $0x38] sm:$0xff]  ;;  %v59_v53 = vsub.s32 1, %v54_v48  ;;  %v67_v55 = vsub.s32 3, %v54_v48 }
  0x21   :  { %611 = vmatprep.subr.bf16.mxu1 %v1978_v14  ;;  %571 = vmatpush1.bf16.msra.mxu0 %v1980_v15  ;;  %v2050_v33 = vld [vmem:[#allocation4 + $0xa4] ss:$16 sps:$4 sm:$0xff]   ;;  %v2052_v34 = vld [vmem:[#allocation4 + $0xac] ss:$16 sps:$4 sm:$0xff]   ;;  %v2060_v36 = vld [vmem:[#allocation4 + $0xa8] ss:$16 sps:$4 sm:$0xff]  }
  0x22   :  { %612 = vmatpush1.bf16.msra.mxu1 %v1984_v16  ;;  %187 = vmatprep.mubr.f32.mxu0 %v1896_v1  ;;  %v2071_v38 = vld [vmem:[#allocation4 + $0xc4] ss:$16 sps:$4 sm:$0xff]   ;;  %v2073_v39 = vld [vmem:[#allocation4 + $0xcc] ss:$16 sps:$4 sm:$0xff]   ;;  %v2077_v40 = vld [vmem:[#allocation4 + $0xc0] ss:$16 sps:$4 sm:$0xff]  }
  0x23   :  { %300 = vmatprep.mubr.f32.mxu1 %v1896_v1  ;;  %1554 = vmatmul.mubr.msk.f32.gmra.mrb[4].mxu0 %vm77_vm1, %v43_v17  ;;  %v2079_v41 = vld [vmem:[#allocation4 + $0xc8] ss:$16 sps:$4 sm:$0xff]   ;;  %v2090_v43 = vld [vmem:[#allocation4 + $0xe4] ss:$16 sps:$4 sm:$0xff]   ;;  %v2092_v44 = vld [vmem:[#allocation4 + $0xec] ss:$16 sps:$4 sm:$0xff]  }
  0x24   :  { %1564 = vmatmul.mubr.msk.f32.gmra.mrb[4].mxu1 %vm77_vm1, %v43_v17  ;;  %572 = vmatprep.subr.bf16.mxu0 %v1993_v18  ;;  %v2096_v45 = vld [vmem:[#allocation4 + $0xe0] ss:$16 sps:$4 sm:$0xff]   ;;  %v2098_v46 = vld [vmem:[#allocation4 + $0xe8] ss:$16 sps:$4 sm:$0xff]   ;;  %s1867_s9 = scalar_lea.vmem %s1535_s8, 128 }
  0x25   :  { %613 = vmatprep.subr.bf16.mxu1 %v1995_v19  ;;  %573 = vmatpush1.bf16.msra.mxu0 %v1999_v20  ;;  %v51_v51 = vld [vmem:[%s2531_s3] sm:$0xf]  ;;  %p1868_p8 = scmp.ne.s32.totalorder %s1535_s8, %s1867_s9  ;;  %p1873_p10 = scmp.lt.s32.totalorder %s1867_s9, %s1867_s9 }
  0x26   :  { %614 = vmatpush1.bf16.msra.mxu1 %v2003_v21  ;;  %193 = vmatprep.mubr.f32.mxu0 %v1896_v1  ;;  %v56_v58 = vrot.slane %v51_v51, %v55_v49  ;;  %v64_v59 = vrot.slane %v51_v51, %v63_v50  ;;  %v60_v60 = vrot.slane %v51_v51, %v59_v53 }
  0x27   :  { %306 = vmatprep.mubr.f32.mxu1 %v1896_v1  ;;  %1555 = vmatmul.mubr.msk.f32.gmra.mrb[6].mxu0 %vm77_vm1, %v44_v22  ;;  %v68_v62 = vrot.slane %v51_v51, %v67_v55  ;;  %p1874_p11 = por %p1873_p10, %p1872_p9 }
  0x28   :  { %1565 = vmatmul.mubr.msk.f32.gmra.mrb[6].mxu1 %vm77_vm1, %v44_v22  ;;  %574 = vmatprep.subr.bf16.mxu0 %v2012_v23 }
  0x29   :  { %615 = vmatprep.subr.bf16.mxu1 %v2016_v24  ;;  %575 = vmatpush1.bf16.msra.mxu0 %v2020_v25  ;;  %p1875_p12 = pnand %p1874_p11, %p1868_p8 }
  0x2a   :  { %616 = vmatpush1.bf16.msra.mxu1 %v2022_v26  ;;  %199 = vmatprep.mubr.f32.mxu0 %v1896_v1 }
  0x2b   :  { %312 = vmatprep.mubr.f32.mxu1 %v1896_v1  ;;  %1556 = vmatmul.mubr.msk.f32.gmra.mrb[8].mxu0 %vm77_vm1, %v45_v27 }
  0x2c   :  { %1566 = vmatmul.mubr.msk.f32.gmra.mrb[8].mxu1 %vm77_vm1, %v45_v27  ;;  %576 = vmatprep.subr.bf16.mxu0 %v2033_v28 }
  0x2d   :  { %617 = vmatprep.subr.bf16.mxu1 %v2035_v29  ;;  %577 = vmatpush1.bf16.msra.mxu0 %v2037_v30 }
  0x2e   :  { %618 = vmatpush1.bf16.msra.mxu1 %v2041_v31  ;;  %205 = vmatprep.mubr.f32.mxu0 %v1896_v1 }
  0x2f   :  { %318 = vmatprep.mubr.f32.mxu1 %v1896_v1  ;;  %1557 = vmatmul.mubr.msk.f32.gmra.mrb[10].mxu0 %vm77_vm1, %v46_v32 }
  0x30   :  { %1567 = vmatmul.mubr.msk.f32.gmra.mrb[10].mxu1 %vm77_vm1, %v46_v32  ;;  %578 = vmatprep.subr.bf16.mxu0 %v2050_v33 }
  0x31   :  { %619 = vmatprep.subr.bf16.mxu1 %v2052_v34  ;;  %579 = vmatpush1.bf16.msra.mxu0 %v2056_v35 }
  0x32   :  { %620 = vmatpush1.bf16.msra.mxu1 %v2060_v36  ;;  %211 = vmatprep.mubr.f32.mxu0 %v1896_v1 }
  0x33   :  { %324 = vmatprep.mubr.f32.mxu1 %v1896_v1  ;;  %1558 = vmatmul.mubr.msk.f32.gmra.mrb[12].mxu0 %vm77_vm1, %v47_v37 }
  0x34   :  { %1568 = vmatmul.mubr.msk.f32.gmra.mrb[12].mxu1 %vm77_vm1, %v47_v37  ;;  %580 = vmatprep.subr.bf16.mxu0 %v2071_v38 }
  0x35   :  { %621 = vmatprep.subr.bf16.mxu1 %v2073_v39  ;;  %581 = vmatpush1.bf16.msra.mxu0 %v2077_v40 }
  0x36   :  { %622 = vmatpush1.bf16.msra.mxu1 %v2079_v41  ;;  %217 = vmatprep.mubr.f32.mxu0 %v1896_v1 }
  0x37   :  { %330 = vmatprep.mubr.f32.mxu1 %v1896_v1  ;;  %1559 = vmatmul.mubr.msk.f32.gmra.mrb[14].mxu0 %vm77_vm1, %v48_v42 }
  0x38   :  { %1569 = vmatmul.mubr.msk.f32.gmra.mrb[14].mxu1 %vm77_vm1, %v48_v42  ;;  %582 = vmatprep.subr.bf16.mxu0 %v2090_v43 }
  0x39   :  { %623 = vmatprep.subr.bf16.mxu1 %v2092_v44  ;;  %583 = vmatpush1.bf16.msra.mxu0 %v2096_v45 }
  0x3a   :  { %624 = vmatpush1.bf16.msra.mxu1 %v2098_v46  ;;  %600 = vmatprep.mubr.bf16.mxu0 %v2535_v2 }
  0x3b   :  { %641 = vmatprep.mubr.bf16.mxu1 %v2535_v2  ;;  %686 = vmatprep.subr.bf16.mxu0 %v1961_v8 }
  0x3c   :  { %727 = vmatprep.subr.bf16.mxu1 %v1963_v9  ;;  %601 = vmatmul.mubr.bf16.vlgmr.msra.gmra.mrb[16].mxu0 %v2535_v2 }
  0x3d   :  { %642 = vmatmul.mubr.bf16.vlgmr.msra.gmra.mrb[16].mxu1 %v2535_v2  ;;  %687 = vmatpush1.bf16.msra.mxu0 %v1965_v10 }
  0x3e   :  { %728 = vmatpush1.bf16.msra.mxu1 %v1967_v11  ;;  %688 = vmatprep.subr.bf16.mxu0 %v1976_v13 }
  0x3f   :  { %729 = vmatprep.subr.bf16.mxu1 %v1978_v14  ;;  %718 = vmatprep.mubr.bf16.mxu0 %v2535_v2 }
  0x40   :  { %759 = vmatprep.mubr.bf16.mxu1 %v2535_v2 }
  0x41   :  { %689 = vmatpush1.bf16.msra.mxu0 %v1980_v15 }
  0x42   :  { %730 = vmatpush1.bf16.msra.mxu1 %v1984_v16  ;;  %690 = vmatprep.subr.bf16.mxu0 %v1993_v18 }
  0x43   :  { %731 = vmatprep.subr.bf16.mxu1 %v1995_v19 }
  0x45   :  { %691 = vmatpush1.bf16.msra.mxu0 %v1999_v20 }
  0x46   :  { %732 = vmatpush1.bf16.msra.mxu1 %v2003_v21  ;;  %692 = vmatprep.subr.bf16.mxu0 %v2012_v23 }
  0x47   :  { %733 = vmatprep.subr.bf16.mxu1 %v2016_v24 }
  0x49   :  { %693 = vmatpush1.bf16.msra.mxu0 %v2020_v25 }
  0x4a   :  { %734 = vmatpush1.bf16.msra.mxu1 %v2022_v26  ;;  %694 = vmatprep.subr.bf16.mxu0 %v2033_v28 }
  0x4b   :  { %735 = vmatprep.subr.bf16.mxu1 %v2035_v29 }
  0x4d   :  { %695 = vmatpush1.bf16.msra.mxu0 %v2037_v30 }
  0x4e   :  { %736 = vmatpush1.bf16.msra.mxu1 %v2041_v31  ;;  %696 = vmatprep.subr.bf16.mxu0 %v2050_v33 }
  0x4f   :  { %737 = vmatprep.subr.bf16.mxu1 %v2052_v34 }
  0x51   :  { %697 = vmatpush1.bf16.msra.mxu0 %v2056_v35 }
  0x52   :  { %738 = vmatpush1.bf16.msra.mxu1 %v2060_v36  ;;  %698 = vmatprep.subr.bf16.mxu0 %v2071_v38 }
  0x53   :  { %739 = vmatprep.subr.bf16.mxu1 %v2073_v39 }
  0x55   :  { %699 = vmatpush1.bf16.msra.mxu0 %v2077_v40 }
  0x56   :  { %740 = vmatpush1.bf16.msra.mxu1 %v2079_v41  ;;  %700 = vmatprep.subr.bf16.mxu0 %v2090_v43 }
  0x57   :  { %741 = vmatprep.subr.bf16.mxu1 %v2092_v44 }
  0x59   :  { %701 = vmatpush1.bf16.msra.mxu0 %v2096_v45 }
  0x5a   :  { %742 = vmatpush1.bf16.msra.mxu1 %v2098_v46  ;;  %804 = vmatprep.subr.bf16.mxu0 %v1961_v8 }
  0x5b   :  { %845 = vmatprep.subr.bf16.mxu1 %v1963_v9 }
  0xee   :  { %v2151_v52 = vpop.f32.mrb[0].mxu0 }
  0xef   :  { %v2153_v54 = vpop.f32.mrb[0].mxu1  ;;  %v2155_v56 = vpop.f32.mrb[1].mxu0 }
  0xf0   :  { %v2157_v57 = vpop.f32.mrb[1].mxu1 }
  0xf2   :  { %v183_v61 = vpop.f32.mrb[2].mxu0 }
  0xf3   :  { %v296_v63 = vpop.f32.mrb[2].mxu1  ;;  %v2159_v0 = vadd.f32 %v183_v61, %v56_v58  ;;  %v185_v1 = vpop.f32.mrb[3].mxu0 }
  0xf4   :  { %v2161_v3 = vadd.f32 %v296_v63, %v64_v59  ;;  %v298_v4 = vpop.f32.mrb[3].mxu1  ;;  %v2163_v5 = vadd.f32 %v185_v1, %v60_v60 }
  0xf5   :  { %v2165_v6 = vadd.f32 %v298_v4, %v68_v62 }
  0xf6   :  { %v189_v7 = vpop.f32.mrb[4].mxu0 }
  0xf7   :  { %v302_v12 = vpop.f32.mrb[4].mxu1  ;;  %v2167_v17 = vadd.f32 %v189_v7, %v56_v58  ;;  %v191_v22 = vpop.f32.mrb[5].mxu0 }
  0xf8   :  { %v2169_v27 = vadd.f32 %v302_v12, %v64_v59  ;;  %v304_v32 = vpop.f32.mrb[5].mxu1  ;;  %v2171_v37 = vadd.f32 %v191_v22, %v60_v60 }
  0xf9   :  { %v2173_v42 = vadd.f32 %v304_v32, %v68_v62 }
  0xfa   :  { %v195_v47 = vpop.f32.mrb[6].mxu0 }
  0xfb   :  { %2537 = vst [vmem:[#allocation10_spill] sm:$0xff] %v2173_v42  ;;  %v308_v48 = vpop.f32.mrb[6].mxu1  ;;  %v2175_v49 = vadd.f32 %v195_v47, %v56_v58  ;;  %v197_v50 = vpop.f32.mrb[7].mxu0 }
  0xfc   :  { %v2177_v51 = vadd.f32 %v308_v48, %v64_v59  ;;  %v310_v53 = vpop.f32.mrb[7].mxu1  ;;  %v2179_v55 = vadd.f32 %v197_v50, %v60_v60 }
  0xfd   :  { %2538 = vst [vmem:[#allocation11_spill] sm:$0xff] %v2175_v49  ;;  %v2181_v61 = vadd.f32 %v310_v53, %v68_v62 }
  0xfe   :  { %2539 = vst [vmem:[#allocation12_spill] sm:$0xff] %v2177_v51  ;;  %2540 = vst [vmem:[#allocation13_spill] sm:$0xff] %v2179_v55  ;;  %v201_v63 = vpop.f32.mrb[8].mxu0 }
  0xff   :  { %2541 = vst [vmem:[#allocation14_spill] sm:$0xff] %v2181_v61  ;;  %v314_v1 = vpop.f32.mrb[8].mxu1  ;;  %v2183_v4 = vadd.f32 %v201_v63, %v56_v58  ;;  %v203_v7 = vpop.f32.mrb[9].mxu0 }
 0x100   :  { %v2185_v12 = vadd.f32 %v314_v1, %v64_v59  ;;  %v316_v22 = vpop.f32.mrb[9].mxu1  ;;  %v2187_v32 = vadd.f32 %v203_v7, %v60_v60 }
 0x101   :  { %2542 = vst [vmem:[#allocation15_spill] sm:$0xff] %v2183_v4  ;;  %v2189_v47 = vadd.f32 %v316_v22, %v68_v62 }
 0x102   :  { %2543 = vst [vmem:[#allocation16_spill] sm:$0xff] %v2185_v12  ;;  %2544 = vst [vmem:[#allocation17_spill] sm:$0xff] %v2187_v32  ;;  %v207_v2 = vpop.f32.mrb[10].mxu0 }
 0x103   :  { %2545 = vst [vmem:[#allocation18_spill] sm:$0xff] %v2189_v47  ;;  %v320_v48 = vpop.f32.mrb[10].mxu1  ;;  %v2191_v51 = vadd.f32 %v207_v2, %v56_v58  ;;  %v209_v50 = vpop.f32.mrb[11].mxu0 }
 0x104   :  { %v2193_v55 = vadd.f32 %v320_v48, %v64_v59  ;;  %v322_v53 = vpop.f32.mrb[11].mxu1  ;;  %v2195_v61 = vadd.f32 %v209_v50, %v60_v60 }
 0x105   :  { %2546 = vst [vmem:[#allocation19_spill] sm:$0xff] %v2191_v51  ;;  %v2197_v63 = vadd.f32 %v322_v53, %v68_v62 }
 0x106   :  { %2547 = vst [vmem:[#allocation20_spill] sm:$0xff] %v2193_v55  ;;  %2548 = vst [vmem:[#allocation21_spill] sm:$0xff] %v2195_v61  ;;  %v213_v4 = vpop.f32.mrb[12].mxu0 }
 0x107   :  { %2549 = vst [vmem:[#allocation22_spill] sm:$0xff] %v2197_v63  ;;  %v326_v1 = vpop.f32.mrb[12].mxu1  ;;  %v2199_v12 = vadd.f32 %v213_v4, %v56_v58  ;;  %v215_v7 = vpop.f32.mrb[13].mxu0 }
 0x108   :  { %v2201_v32 = vadd.f32 %v326_v1, %v64_v59  ;;  %v328_v22 = vpop.f32.mrb[13].mxu1  ;;  %v2203_v47 = vadd.f32 %v215_v7, %v60_v60  ;;  %v178_v1 = vadd.f32 %v2151_v52, %v56_v58  ;;  %v180_v7 = vadd.f32 %v2155_v56, %v60_v60 }
 0x109   :  { %2550 = vst [vmem:[#allocation23_spill] sm:$0xff] %v2199_v12  ;;  %v2205_v2 = vadd.f32 %v328_v22, %v68_v62  ;;  %v293_v22 = vadd.f32 %v2157_v57, %v68_v62 }
 0x10a   :  { %2551 = vst [vmem:[#allocation24_spill] sm:$0xff] %v2201_v32  ;;  %2552 = vst [vmem:[#allocation25_spill] sm:$0xff] %v2203_v47  ;;  %v219_v51 = vpop.f32.mrb[14].mxu0  ;;  %v291_v32 = vadd.f32 %v2153_v54, %v64_v59 }
 0x10b   :  { %2553 = vst [vmem:[#allocation26_spill] sm:$0xff] %v2205_v2  ;;  %v332_v48 = vpop.f32.mrb[14].mxu1  ;;  %v2207_v55 = vadd.f32 %v219_v51, %v56_v58  ;;  %v221_v50 = vpop.f32.mrb[15].mxu0 }
 0x10c   :  { %v2209_v61 = vadd.f32 %v332_v48, %v64_v59  ;;  %v334_v53 = vpop.f32.mrb[15].mxu1  ;;  %v2211_v63 = vadd.f32 %v221_v50, %v60_v60 }
 0x10d   :  { %2554 = vst [vmem:[#allocation27_spill] sm:$0xff] %v2207_v55  ;;  %v2213_v4 = vadd.f32 %v334_v53, %v68_v62 }
 0x10e   :  { %2555 = vst [vmem:[#allocation28_spill] sm:$0xff] %v2209_v61  ;;  %2556 = vst [vmem:[#allocation29_spill] sm:$0xff] %v2211_v63 }
 0x10f   :  { %2557 = vst [vmem:[#allocation30_spill] sm:$0xff] %v2213_v4  ;;  %v602_v2 = vpop.f32.mrb[16].mxu0 }
 0x110   :  { %v643_v47 = vpop.f32.mrb[16].mxu1  ;;  %v650_v51 = vadd.f32 %v602_v2, %v178_v1  ;;  %v604_v12 = vpop.f32.mrb[17].mxu0 }
 0x111   :  { %v652_v55 = vadd.f32 %v643_v47, %v291_v32  ;;  %v645_v48 = vpop.f32.mrb[17].mxu1  ;;  %v651_v61 = vadd.f32 %v604_v12, %v180_v7  ;;  %v606_v50 = vpop.f32.mrb[18].mxu0 }
 0x112   :  { %v653_v49 = vadd.f32 %v645_v48, %v293_v22  ;;  %v647_v63 = vpop.f32.mrb[18].mxu1  ;;  %v1602_v53 = vmul.f32 -1.442695, %v650_v51  ;;  %v607_v4 = vpop.f32.mrb[19].mxu0 }
 0x113   :  { %v648_v42 = vpop.f32.mrb[19].mxu1  ;;  %v1603_v52 = vmul.f32 -1.442695, %v651_v61 }
 0x114   :  { %1685 = vpow2.f32 %v1602_v53  ;;  %v1604_v54 = vmul.f32 -1.442695, %v653_v49 }
 0x115   :  { %1687 = vpow2.f32 %v1603_v52 }
 0x116   :  { %1689 = vpow2.f32 %v1604_v54 }
 0x117   :  { %1691 = vtanh.f32 %v652_v55  ;;  %v2558_v55 = vmov 0  }
 0x11e   :  { %v1686_v56 = vpop.eup %1685 }
 0x11f   :  { %v1688_v58 = vpop.eup %1687  ;;  %v657_v57 = vadd.f32 1.0, %v1686_v56 }
 0x120   :  { %v663_v59 = vadd.f32 1.0, %v1688_v58  ;;  %v1690_v60 = vpop.eup %1689 }
 0x121   :  { %1693 = vrcp.f32 %v657_v57  ;;  %v1692_v62 = vpop.eup %1691  ;;  %v670_v63 = vadd.f32 1.0, %v1690_v60 }
 0x122   :  { %1695 = vrcp.f32 %v663_v59 }
 0x123   :  { %1697 = vrcp.f32 %v670_v63 }
 0x12b   :  { %v1694_v12 = vpop.eup %1693 }
 0x12c   :  { %v1696_v32 = vpop.eup %1695  ;;  %v674_v47 = vmul.f32 %v1694_v12, %v1692_v62 }
 0x12d   :  { %v673_v2 = vmul.f32 0.0, %v1696_v32  ;;  %v1698_v49 = vpop.eup %1697 }
 0x12f   :  { %v2219_v42 = vadd.f32 %v674_v47, %v673_v2 }
 0x131   :  { %1699 = vtanh.f32 %v2219_v42 }
 0x13b   :  { %v1700_v61 = vpop.eup %1699 }
 0x13c   :  { %v677_v4 = vmul.f32 %v1700_v61, %v1698_v49 }
 0x13e   :  { %v685_v1 = vpack.c.bf16 %v677_v4, %v677_v4 }
 0x140   :  { %719 = vmatmul.mubr.bf16.vlgmr.msra.gmra.mrb[20].mxu0 %v685_v1  ;;  %760 = vmatmul.mubr.bf16.vlgmr.msra.gmra.mrb[20].mxu1 %v685_v1 }
 0x141   :  { %805 = vmatpush1.bf16.msra.mxu0 %v1965_v10  ;;  %846 = vmatpush1.bf16.msra.mxu1 %v1967_v11 }
 0x142   :  { %806 = vmatprep.subr.bf16.mxu0 %v1976_v13  ;;  %847 = vmatprep.subr.bf16.mxu1 %v1978_v14 }
 0x143   :  { %836 = vmatprep.mubr.bf16.mxu0 %v2558_v55  ;;  %877 = vmatprep.mubr.bf16.mxu1 %v2558_v55 }
 0x145   :  { %807 = vmatpush1.bf16.msra.mxu0 %v1980_v15  ;;  %848 = vmatpush1.bf16.msra.mxu1 %v1984_v16 }
 0x146   :  { %808 = vmatprep.subr.bf16.mxu0 %v1993_v18  ;;  %849 = vmatprep.subr.bf16.mxu1 %v1995_v19 }
 0x149   :  { %809 = vmatpush1.bf16.msra.mxu0 %v1999_v20  ;;  %850 = vmatpush1.bf16.msra.mxu1 %v2003_v21 }
 0x14a   :  { %810 = vmatprep.subr.bf16.mxu0 %v2012_v23  ;;  %851 = vmatprep.subr.bf16.mxu1 %v2016_v24 }
 0x14d   :  { %811 = vmatpush1.bf16.msra.mxu0 %v2020_v25  ;;  %852 = vmatpush1.bf16.msra.mxu1 %v2022_v26 }
 0x14e   :  { %812 = vmatprep.subr.bf16.mxu0 %v2033_v28  ;;  %853 = vmatprep.subr.bf16.mxu1 %v2035_v29 }
 0x151   :  { %813 = vmatpush1.bf16.msra.mxu0 %v2037_v30  ;;  %854 = vmatpush1.bf16.msra.mxu1 %v2041_v31 }
 0x152   :  { %814 = vmatprep.subr.bf16.mxu0 %v2050_v33  ;;  %855 = vmatprep.subr.bf16.mxu1 %v2052_v34 }
 0x155   :  { %815 = vmatpush1.bf16.msra.mxu0 %v2056_v35  ;;  %856 = vmatpush1.bf16.msra.mxu1 %v2060_v36 }
 0x156   :  { %816 = vmatprep.subr.bf16.mxu0 %v2071_v38  ;;  %857 = vmatprep.subr.bf16.mxu1 %v2073_v39 }
 0x159   :  { %817 = vmatpush1.bf16.msra.mxu0 %v2077_v40  ;;  %858 = vmatpush1.bf16.msra.mxu1 %v2079_v41 }
 0x15a   :  { %818 = vmatprep.subr.bf16.mxu0 %v2090_v43  ;;  %859 = vmatprep.subr.bf16.mxu1 %v2092_v44 }
 0x15d   :  { %819 = vmatpush1.bf16.msra.mxu0 %v2096_v45  ;;  %860 = vmatpush1.bf16.msra.mxu1 %v2098_v46 }
 0x15e   :  { %922 = vmatprep.subr.bf16.mxu0 %v1961_v8  ;;  %963 = vmatprep.subr.bf16.mxu1 %v1963_v9 }
 0x213   :  { %v720_v7 = vpop.f32.mrb[20].mxu0  ;;  %v761_v22 = vpop.f32.mrb[20].mxu1 }
 0x214   :  { %v768_v51 = vadd.f32 %v720_v7, %v2159_v0  ;;  %v770_v48 = vadd.f32 %v761_v22, %v2161_v3  ;;  %v722_v50 = vpop.f32.mrb[21].mxu0  ;;  %v763_v53 = vpop.f32.mrb[21].mxu1 }
 0x215   :  { %v769_v52 = vadd.f32 %v722_v50, %v2163_v5  ;;  %v771_v54 = vadd.f32 %v763_v53, %v2165_v6  ;;  %v724_v56 = vpop.f32.mrb[22].mxu0  ;;  %v765_v58 = vpop.f32.mrb[22].mxu1 }
 0x216   :  { %v1605_v57 = vmul.f32 -1.442695, %v768_v51  ;;  %v725_v59 = vpop.f32.mrb[23].mxu0  ;;  %v766_v60 = vpop.f32.mrb[23].mxu1 }
 0x217   :  { %v1606_v62 = vmul.f32 -1.442695, %v769_v52  ;;  %v1607_v12 = vmul.f32 -1.442695, %v771_v54 }
 0x218   :  { %1701 = vpow2.f32 %v1605_v57  ;;  %v2559_v57 = vld [vmem:[#allocation10_spill] sm:$0xff] }
 0x219   :  { %1703 = vpow2.f32 %v1606_v62 }
 0x21a   :  { %1705 = vpow2.f32 %v1607_v12 }
 0x21b   :  { %1707 = vtanh.f32 %v770_v48 }
 0x222   :  { %v1702_v32 = vpop.eup %1701 }
 0x223   :  { %v1704_v47 = vpop.eup %1703  ;;  %v775_v0 = vadd.f32 1.0, %v1702_v32 }
 0x224   :  { %v781_v3 = vadd.f32 1.0, %v1704_v47  ;;  %v1706_v5 = vpop.eup %1705 }
 0x225   :  { %1709 = vrcp.f32 %v775_v0  ;;  %v1708_v63 = vpop.eup %1707  ;;  %v788_v61 = vadd.f32 1.0, %v1706_v5 }
 0x226   :  { %1711 = vrcp.f32 %v781_v3 }
 0x227   :  { %1713 = vrcp.f32 %v788_v61 }
 0x22f   :  { %v1710_v6 = vpop.eup %1709 }
 0x230   :  { %v1712_v2 = vpop.eup %1711  ;;  %v792_v49 = vmul.f32 %v1710_v6, %v1708_v63 }
 0x231   :  { %v791_v4 = vmul.f32 %v1712_v2, %v2219_v42  ;;  %v1714_v7 = vpop.eup %1713 }
 0x233   :  { %v2261_v1 = vadd.f32 %v792_v49, %v791_v4 }
 0x235   :  { %1715 = vtanh.f32 %v2261_v1 }
 0x23f   :  { %v1716_v22 = vpop.eup %1715 }
 0x240   :  { %v795_v51 = vmul.f32 %v1716_v22, %v1714_v7 }
 0x242   :  { %v803_v48 = vpack.c.bf16 %v795_v51, %v795_v51 }
 0x244   :  { %837 = vmatmul.mubr.bf16.vlgmr.msra.gmra.mrb[24].mxu0 %v803_v48  ;;  %878 = vmatmul.mubr.bf16.vlgmr.msra.gmra.mrb[24].mxu1 %v803_v48 }
 0x245   :  { %923 = vmatpush1.bf16.msra.mxu0 %v1965_v10  ;;  %964 = vmatpush1.bf16.msra.mxu1 %v1967_v11 }
 0x246   :  { %924 = vmatprep.subr.bf16.mxu0 %v1976_v13  ;;  %965 = vmatprep.subr.bf16.mxu1 %v1978_v14 }
 0x247   :  { %954 = vmatprep.mubr.bf16.mxu0 %v2558_v55  ;;  %995 = vmatprep.mubr.bf16.mxu1 %v2558_v55 }
 0x249   :  { %925 = vmatpush1.bf16.msra.mxu0 %v1980_v15  ;;  %966 = vmatpush1.bf16.msra.mxu1 %v1984_v16 }
 0x24a   :  { %926 = vmatprep.subr.bf16.mxu0 %v1993_v18  ;;  %967 = vmatprep.subr.bf16.mxu1 %v1995_v19 }
 0x24d   :  { %927 = vmatpush1.bf16.msra.mxu0 %v1999_v20  ;;  %968 = vmatpush1.bf16.msra.mxu1 %v2003_v21 }
 0x24e   :  { %928 = vmatprep.subr.bf16.mxu0 %v2012_v23  ;;  %969 = vmatprep.subr.bf16.mxu1 %v2016_v24 }
 0x251   :  { %929 = vmatpush1.bf16.msra.mxu0 %v2020_v25  ;;  %970 = vmatpush1.bf16.msra.mxu1 %v2022_v26 }
 0x252   :  { %930 = vmatprep.subr.bf16.mxu0 %v2033_v28  ;;  %971 = vmatprep.subr.bf16.mxu1 %v2035_v29 }
 0x255   :  { %931 = vmatpush1.bf16.msra.mxu0 %v2037_v30  ;;  %972 = vmatpush1.bf16.msra.mxu1 %v2041_v31 }
 0x256   :  { %932 = vmatprep.subr.bf16.mxu0 %v2050_v33  ;;  %973 = vmatprep.subr.bf16.mxu1 %v2052_v34 }
 0x259   :  { %933 = vmatpush1.bf16.msra.mxu0 %v2056_v35  ;;  %974 = vmatpush1.bf16.msra.mxu1 %v2060_v36 }
 0x25a   :  { %934 = vmatprep.subr.bf16.mxu0 %v2071_v38  ;;  %975 = vmatprep.subr.bf16.mxu1 %v2073_v39 }
 0x25d   :  { %935 = vmatpush1.bf16.msra.mxu0 %v2077_v40  ;;  %976 = vmatpush1.bf16.msra.mxu1 %v2079_v41 }
 0x25e   :  { %936 = vmatprep.subr.bf16.mxu0 %v2090_v43  ;;  %977 = vmatprep.subr.bf16.mxu1 %v2092_v44 }
 0x261   :  { %937 = vmatpush1.bf16.msra.mxu0 %v2096_v45  ;;  %978 = vmatpush1.bf16.msra.mxu1 %v2098_v46 }
 0x262   :  { %1040 = vmatprep.subr.bf16.mxu0 %v1961_v8  ;;  %1081 = vmatprep.subr.bf16.mxu1 %v1963_v9 }
 0x317   :  { %v838_v42 = vpop.f32.mrb[24].mxu0  ;;  %v879_v50 = vpop.f32.mrb[24].mxu1 }
 0x318   :  { %v886_v53 = vadd.f32 %v838_v42, %v2167_v17  ;;  %v888_v52 = vadd.f32 %v879_v50, %v2169_v27  ;;  %v840_v54 = vpop.f32.mrb[25].mxu0  ;;  %v881_v56 = vpop.f32.mrb[25].mxu1 }
 0x319   :  { %v887_v58 = vadd.f32 %v840_v54, %v2171_v37  ;;  %v889_v59 = vadd.f32 %v881_v56, %v2559_v57  ;;  %v842_v60 = vpop.f32.mrb[26].mxu0  ;;  %v883_v62 = vpop.f32.mrb[26].mxu1  ;;  %v2561_v56 = vld [vmem:[#allocation12_spill] sm:$0xff] }
 0x31a   :  { %v1608_v12 = vmul.f32 -1.442695, %v886_v53  ;;  %v843_v32 = vpop.f32.mrb[27].mxu0  ;;  %v884_v47 = vpop.f32.mrb[27].mxu1  ;;  %v2562_v60 = vld [vmem:[#allocation13_spill] sm:$0xff] }
 0x31b   :  { %v1609_v0 = vmul.f32 -1.442695, %v887_v58  ;;  %v1610_v3 = vmul.f32 -1.442695, %v889_v59 }
 0x31c   :  { %1717 = vpow2.f32 %v1608_v12  ;;  %v2563_v12 = vld [vmem:[#allocation14_spill] sm:$0xff] }
 0x31d   :  { %1719 = vpow2.f32 %v1609_v0 }
 0x31e   :  { %1721 = vpow2.f32 %v1610_v3 }
 0x31f   :  { %1723 = vtanh.f32 %v888_v52  ;;  %v2560_v52 = vld [vmem:[#allocation11_spill] sm:$0xff] }
 0x326   :  { %v1718_v5 = vpop.eup %1717 }
 0x327   :  { %v1720_v63 = vpop.eup %1719  ;;  %v893_v17 = vadd.f32 1.0, %v1718_v5 }
 0x328   :  { %v899_v27 = vadd.f32 1.0, %v1720_v63  ;;  %v1722_v37 = vpop.eup %1721 }
 0x329   :  { %1725 = vrcp.f32 %v893_v17  ;;  %v1724_v6 = vpop.eup %1723  ;;  %v906_v4 = vadd.f32 1.0, %v1722_v37 }
 0x32a   :  { %1727 = vrcp.f32 %v899_v27 }
 0x32b   :  { %1729 = vrcp.f32 %v906_v4 }
 0x333   :  { %v1726_v2 = vpop.eup %1725 }
 0x334   :  { %v1728_v49 = vpop.eup %1727  ;;  %v910_v61 = vmul.f32 %v1726_v2, %v1724_v6 }
 0x335   :  { %v909_v7 = vmul.f32 %v1728_v49, %v2261_v1  ;;  %v1730_v51 = vpop.eup %1729 }
 0x337   :  { %v2303_v22 = vadd.f32 %v910_v61, %v909_v7 }
 0x339   :  { %1731 = vtanh.f32 %v2303_v22 }
 0x343   :  { %v1732_v48 = vpop.eup %1731 }
 0x344   :  { %v913_v42 = vmul.f32 %v1732_v48, %v1730_v51 }
 0x346   :  { %v921_v50 = vpack.c.bf16 %v913_v42, %v913_v42 }
 0x348   :  { %955 = vmatmul.mubr.bf16.vlgmr.msra.gmra.mrb[28].mxu0 %v921_v50  ;;  %996 = vmatmul.mubr.bf16.vlgmr.msra.gmra.mrb[28].mxu1 %v921_v50 }
 0x349   :  { %1041 = vmatpush1.bf16.msra.mxu0 %v1965_v10  ;;  %1082 = vmatpush1.bf16.msra.mxu1 %v1967_v11 }
 0x34a   :  { %1042 = vmatprep.subr.bf16.mxu0 %v1976_v13  ;;  %1083 = vmatprep.subr.bf16.mxu1 %v1978_v14 }
 0x34b   :  { %1072 = vmatprep.mubr.bf16.mxu0 %v2558_v55  ;;  %1113 = vmatprep.mubr.bf16.mxu1 %v2558_v55 }
 0x34d   :  { %1043 = vmatpush1.bf16.msra.mxu0 %v1980_v15  ;;  %1084 = vmatpush1.bf16.msra.mxu1 %v1984_v16 }
 0x34e   :  { %1044 = vmatprep.subr.bf16.mxu0 %v1993_v18  ;;  %1085 = vmatprep.subr.bf16.mxu1 %v1995_v19 }
 0x351   :  { %1045 = vmatpush1.bf16.msra.mxu0 %v1999_v20  ;;  %1086 = vmatpush1.bf16.msra.mxu1 %v2003_v21 }
 0x352   :  { %1046 = vmatprep.subr.bf16.mxu0 %v2012_v23  ;;  %1087 = vmatprep.subr.bf16.mxu1 %v2016_v24 }
 0x355   :  { %1047 = vmatpush1.bf16.msra.mxu0 %v2020_v25  ;;  %1088 = vmatpush1.bf16.msra.mxu1 %v2022_v26 }
 0x356   :  { %1048 = vmatprep.subr.bf16.mxu0 %v2033_v28  ;;  %1089 = vmatprep.subr.bf16.mxu1 %v2035_v29 }
 0x359   :  { %1049 = vmatpush1.bf16.msra.mxu0 %v2037_v30  ;;  %1090 = vmatpush1.bf16.msra.mxu1 %v2041_v31 }
 0x35a   :  { %1050 = vmatprep.subr.bf16.mxu0 %v2050_v33  ;;  %1091 = vmatprep.subr.bf16.mxu1 %v2052_v34 }
 0x35d   :  { %1051 = vmatpush1.bf16.msra.mxu0 %v2056_v35  ;;  %1092 = vmatpush1.bf16.msra.mxu1 %v2060_v36 }
 0x35e   :  { %1052 = vmatprep.subr.bf16.mxu0 %v2071_v38  ;;  %1093 = vmatprep.subr.bf16.mxu1 %v2073_v39 }
 0x361   :  { %1053 = vmatpush1.bf16.msra.mxu0 %v2077_v40  ;;  %1094 = vmatpush1.bf16.msra.mxu1 %v2079_v41 }
 0x362   :  { %1054 = vmatprep.subr.bf16.mxu0 %v2090_v43  ;;  %1095 = vmatprep.subr.bf16.mxu1 %v2092_v44 }
 0x365   :  { %1055 = vmatpush1.bf16.msra.mxu0 %v2096_v45  ;;  %1096 = vmatpush1.bf16.msra.mxu1 %v2098_v46 }
 0x366   :  { %1158 = vmatprep.subr.bf16.mxu0 %v1961_v8  ;;  %1199 = vmatprep.subr.bf16.mxu1 %v1963_v9 }
 0x41b   :  { %v956_v1 = vpop.f32.mrb[28].mxu0  ;;  %v997_v53 = vpop.f32.mrb[28].mxu1 }
 0x41c   :  { %v1004_v54 = vadd.f32 %v956_v1, %v2560_v52  ;;  %v1006_v58 = vadd.f32 %v997_v53, %v2561_v56  ;;  %v958_v57 = vpop.f32.mrb[29].mxu0  ;;  %v999_v59 = vpop.f32.mrb[29].mxu1 }
 0x41d   :  { %v1005_v62 = vadd.f32 %v958_v57, %v2562_v60  ;;  %v1007_v32 = vadd.f32 %v999_v59, %v2563_v12  ;;  %v960_v47 = vpop.f32.mrb[30].mxu0  ;;  %v1001_v0 = vpop.f32.mrb[30].mxu1 }
 0x41e   :  { %v1611_v3 = vmul.f32 -1.442695, %v1004_v54  ;;  %v961_v5 = vpop.f32.mrb[31].mxu0  ;;  %v1002_v63 = vpop.f32.mrb[31].mxu1 }
 0x41f   :  { %v1612_v8 = vmul.f32 -1.442695, %v1005_v62  ;;  %v1613_v9 = vmul.f32 -1.442695, %v1007_v32 }
 0x420   :  { %1733 = vpow2.f32 %v1611_v3 }
 0x421   :  { %1735 = vpow2.f32 %v1612_v8  ;;  %v2394_v8 = vld [vmem:[#allocation4] ss:$16 sps:$4 sm:$0xff]  }
 0x422   :  { %1737 = vpow2.f32 %v1613_v9  ;;  %v2397_v9 = vld [vmem:[#allocation4 + $0x8] ss:$16 sps:$4 sm:$0xff]  }
 0x423   :  { %1739 = vtanh.f32 %v1006_v58 }
 0x42a   :  { %v1734_v17 = vpop.eup %1733 }
 0x42b   :  { %v1736_v27 = vpop.eup %1735  ;;  %v1011_v37 = vadd.f32 1.0, %v1734_v17  ;;  %v2400_v17 = vld [vmem:[#allocation4 + $0x24] ss:$16 sps:$4 sm:$0xff]  }
 0x42c   :  { %v1017_v6 = vadd.f32 1.0, %v1736_v27  ;;  %v1738_v2 = vpop.eup %1737  ;;  %v2403_v27 = vld [vmem:[#allocation4 + $0x2c] ss:$16 sps:$4 sm:$0xff]  }
 0x42d   :  { %1741 = vrcp.f32 %v1011_v37  ;;  %v1740_v49 = vpop.eup %1739  ;;  %v1024_v51 = vadd.f32 1.0, %v1738_v2  ;;  %v2408_v37 = vld [vmem:[#allocation4 + $0x20] ss:$16 sps:$4 sm:$0xff]   ;;  %v2414_v2 = vld [vmem:[#allocation4 + $0x44] ss:$16 sps:$4 sm:$0xff]  }
 0x42e   :  { %1743 = vrcp.f32 %v1017_v6  ;;  %v2411_v6 = vld [vmem:[#allocation4 + $0x28] ss:$16 sps:$4 sm:$0xff]  }
 0x42f   :  { %1745 = vrcp.f32 %v1024_v51  ;;  %v2429_v51 = vld [vmem:[#allocation4 + $0x6c] ss:$16 sps:$4 sm:$0xff]  }
 0x437   :  { %v1742_v61 = vpop.eup %1741 }
 0x438   :  { %v1744_v4 = vpop.eup %1743  ;;  %v1028_v7 = vmul.f32 %v1742_v61, %v1740_v49  ;;  %v2417_v49 = vld [vmem:[#allocation4 + $0x4c] ss:$16 sps:$4 sm:$0xff]   ;;  %v2420_v61 = vld [vmem:[#allocation4 + $0x40] ss:$16 sps:$4 sm:$0xff]  }
 0x439   :  { %v1027_v48 = vmul.f32 %v1744_v4, %v2303_v22  ;;  %v1746_v50 = vpop.eup %1745  ;;  %v2423_v4 = vld [vmem:[#allocation4 + $0x48] ss:$16 sps:$4 sm:$0xff]  }
 0x43b   :  { %v2345_v42 = vadd.f32 %v1028_v7, %v1027_v48  ;;  %v2426_v7 = vld [vmem:[#allocation4 + $0x64] ss:$16 sps:$4 sm:$0xff]   ;;  %v2432_v48 = vld [vmem:[#allocation4 + $0x60] ss:$16 sps:$4 sm:$0xff]  }
 0x43d   :  { %1747 = vtanh.f32 %v2345_v42 }
 0x447   :  { %v1748_v1 = vpop.eup %1747 }
 0x448   :  { %v1031_v53 = vmul.f32 %v1748_v1, %v1746_v50  ;;  %v2438_v50 = vld [vmem:[#allocation4 + $0x84] ss:$16 sps:$4 sm:$0xff]   ;;  %v2441_v1 = vld [vmem:[#allocation4 + $0x8c] ss:$16 sps:$4 sm:$0xff]  }
 0x44a   :  { %v1039_v52 = vpack.c.bf16 %v1031_v53, %v1031_v53  ;;  %v2444_v53 = vld [vmem:[#allocation4 + $0x80] ss:$16 sps:$4 sm:$0xff]  }
 0x44c   :  { %1073 = vmatmul.mubr.bf16.vlgmr.msra.gmra.mrb[32].mxu0 %v1039_v52  ;;  %1114 = vmatmul.mubr.bf16.vlgmr.msra.gmra.mrb[32].mxu1 %v1039_v52  ;;  %v2447_v52 = vld [vmem:[#allocation4 + $0x88] ss:$16 sps:$4 sm:$0xff]  }
 0x44d   :  { %1159 = vmatpush1.bf16.msra.mxu0 %v1965_v10  ;;  %1200 = vmatpush1.bf16.msra.mxu1 %v1967_v11  ;;  %v2380_v10 = vld [vmem:[#allocation4 + $0x4] ss:$16 sps:$4 sm:$0xff]   ;;  %v2383_v11 = vld [vmem:[#allocation4 + $0xc] ss:$16 sps:$4 sm:$0xff]  }
 0x44e   :  { %1160 = vmatprep.subr.bf16.mxu0 %v1976_v13  ;;  %1201 = vmatprep.subr.bf16.mxu1 %v1978_v14 }
 0x44f   :  { %1190 = vmatprep.mubr.bf16.mxu0 %v2558_v55  ;;  %1231 = vmatprep.mubr.bf16.mxu1 %v2558_v55 }
 0x451   :  { %1161 = vmatpush1.bf16.msra.mxu0 %v1980_v15  ;;  %1202 = vmatpush1.bf16.msra.mxu1 %v1984_v16  ;;  %v2564_v15 = vld [vmem:[#allocation15_spill] sm:$0xff] }
 0x452   :  { %1162 = vmatprep.subr.bf16.mxu0 %v1993_v18  ;;  %1203 = vmatprep.subr.bf16.mxu1 %v1995_v19  ;;  %v2565_v18 = vld [vmem:[#allocation16_spill] sm:$0xff] }
 0x455   :  { %1163 = vmatpush1.bf16.msra.mxu0 %v1999_v20  ;;  %1204 = vmatpush1.bf16.msra.mxu1 %v2003_v21 }
 0x456   :  { %1164 = vmatprep.subr.bf16.mxu0 %v2012_v23  ;;  %1205 = vmatprep.subr.bf16.mxu1 %v2016_v24  ;;  %v2566_v23 = vld [vmem:[#allocation17_spill] sm:$0xff] }
 0x459   :  { %1165 = vmatpush1.bf16.msra.mxu0 %v2020_v25  ;;  %1206 = vmatpush1.bf16.msra.mxu1 %v2022_v26  ;;  %v2567_v25 = vld [vmem:[#allocation18_spill] sm:$0xff] }
 0x45a   :  { %1166 = vmatprep.subr.bf16.mxu0 %v2033_v28  ;;  %1207 = vmatprep.subr.bf16.mxu1 %v2035_v29 }
 0x45d   :  { %1167 = vmatpush1.bf16.msra.mxu0 %v2037_v30  ;;  %1208 = vmatpush1.bf16.msra.mxu1 %v2041_v31 }
 0x45e   :  { %1168 = vmatprep.subr.bf16.mxu0 %v2050_v33  ;;  %1209 = vmatprep.subr.bf16.mxu1 %v2052_v34 }
 0x461   :  { %1169 = vmatpush1.bf16.msra.mxu0 %v2056_v35  ;;  %1210 = vmatpush1.bf16.msra.mxu1 %v2060_v36 }
 0x462   :  { %1170 = vmatprep.subr.bf16.mxu0 %v2071_v38  ;;  %1211 = vmatprep.subr.bf16.mxu1 %v2073_v39 }
 0x465   :  { %1171 = vmatpush1.bf16.msra.mxu0 %v2077_v40  ;;  %1212 = vmatpush1.bf16.msra.mxu1 %v2079_v41 }
 0x466   :  { %1172 = vmatprep.subr.bf16.mxu0 %v2090_v43  ;;  %1213 = vmatprep.subr.bf16.mxu1 %v2092_v44 }
 0x469   :  { %1173 = vmatpush1.bf16.msra.mxu0 %v2096_v45  ;;  %1214 = vmatpush1.bf16.msra.mxu1 %v2098_v46 }
 0x46a   :  { %1276 = vmatprep.subr.bf16.mxu0 %v2380_v10  ;;  %1317 = vmatprep.subr.bf16.mxu1 %v2383_v11 }
 0x51f   :  { %v1074_v13 = vpop.f32.mrb[32].mxu0  ;;  %v1115_v14 = vpop.f32.mrb[32].mxu1 }
 0x520   :  { %v1122_v16 = vadd.f32 %v1074_v13, %v2564_v15  ;;  %v1124_v19 = vadd.f32 %v1115_v14, %v2565_v18  ;;  %v1076_v20 = vpop.f32.mrb[33].mxu0  ;;  %v1117_v21 = vpop.f32.mrb[33].mxu1  ;;  %v2450_v13 = vld [vmem:[#allocation4 + $0xa4] ss:$16 sps:$4 sm:$0xff]   ;;  %v2453_v14 = vld [vmem:[#allocation4 + $0xac] ss:$16 sps:$4 sm:$0xff]  }
 0x521   :  { %v1123_v24 = vadd.f32 %v1076_v20, %v2566_v23  ;;  %v1125_v26 = vadd.f32 %v1117_v21, %v2567_v25  ;;  %v1078_v28 = vpop.f32.mrb[34].mxu0  ;;  %v1119_v29 = vpop.f32.mrb[34].mxu1  ;;  %v2456_v15 = vld [vmem:[#allocation4 + $0xa0] ss:$16 sps:$4 sm:$0xff]   ;;  %v2569_v20 = vld [vmem:[#allocation20_spill] sm:$0xff] }
 0x522   :  { %v1614_v30 = vmul.f32 -1.442695, %v1122_v16  ;;  %v1079_v31 = vpop.f32.mrb[35].mxu0  ;;  %v1120_v33 = vpop.f32.mrb[35].mxu1  ;;  %v2459_v16 = vld [vmem:[#allocation4 + $0xa8] ss:$16 sps:$4 sm:$0xff]  }
 0x523   :  { %v1615_v34 = vmul.f32 -1.442695, %v1123_v24  ;;  %v1616_v35 = vmul.f32 -1.442695, %v1125_v26  ;;  %v2570_v23 = vld [vmem:[#allocation21_spill] sm:$0xff]  ;;  %v2571_v24 = vld [vmem:[#allocation22_spill] sm:$0xff] }
 0x524   :  { %1749 = vpow2.f32 %v1614_v30 }
 0x525   :  { %1751 = vpow2.f32 %v1615_v34 }
 0x526   :  { %1753 = vpow2.f32 %v1616_v35 }
 0x527   :  { %1755 = vtanh.f32 %v1124_v19  ;;  %v2568_v19 = vld [vmem:[#allocation19_spill] sm:$0xff] }
 0x52e   :  { %v1750_v36 = vpop.eup %1749 }
 0x52f   :  { %v1752_v22 = vpop.eup %1751  ;;  %v1129_v54 = vadd.f32 1.0, %v1750_v36 }
 0x530   :  { %v1135_v56 = vadd.f32 1.0, %v1752_v22  ;;  %v1754_v58 = vpop.eup %1753 }
 0x531   :  { %1757 = vrcp.f32 %v1129_v54  ;;  %v1756_v57 = vpop.eup %1755  ;;  %v1142_v12 = vadd.f32 1.0, %v1754_v58 }
 0x532   :  { %1759 = vrcp.f32 %v1135_v56 }
 0x533   :  { %1761 = vrcp.f32 %v1142_v12 }
 0x53b   :  { %v1758_v59 = vpop.eup %1757 }
 0x53c   :  { %v1760_v60 = vpop.eup %1759  ;;  %v1146_v62 = vmul.f32 %v1758_v59, %v1756_v57 }
 0x53d   :  { %v1145_v32 = vmul.f32 %v1760_v60, %v2345_v42  ;;  %v1762_v0 = vpop.eup %1761  ;;  %v2435_v42 = vld [vmem:[#allocation4 + $0x68] ss:$16 sps:$4 sm:$0xff]  }
 0x53f   :  { %v2391_v47 = vadd.f32 %v1146_v62, %v1145_v32  ;;  %v1838_v32 = vld [vmem:[#allocation4 + $0xcc] ss:$16 sps:$4 sm:$0xff]  }
 0x541   :  { %1763 = vtanh.f32 %v2391_v47 }
 0x54b   :  { %v1764_v3 = vpop.eup %1763 }
 0x54c   :  { %v1149_v5 = vmul.f32 %v1764_v3, %v1762_v0  ;;  %v1840_v0 = vld [vmem:[#allocation4 + $0xc8] ss:$16 sps:$4 sm:$0xff]   ;;  %v1841_v3 = vld [vmem:[#allocation4 + $0xe4] ss:$16 sps:$4 sm:$0xff]  }
 0x54e   :  { %v1157_v63 = vpack.c.bf16 %v1149_v5, %v1149_v5  ;;  %v1842_v5 = vld [vmem:[#allocation4 + $0xec] ss:$16 sps:$4 sm:$0xff]  }
 0x550   :  { %1191 = vmatmul.mubr.bf16.vlgmr.msra.gmra.mrb[36].mxu0 %v1157_v63  ;;  %1232 = vmatmul.mubr.bf16.vlgmr.msra.gmra.mrb[36].mxu1 %v1157_v63  ;;  %v1843_v63 = vld [vmem:[#allocation4 + $0xe0] ss:$16 sps:$4 sm:$0xff]  }
 0x551   :  { %1277 = vmatpush1.bf16.msra.mxu0 %v2394_v8  ;;  %1318 = vmatpush1.bf16.msra.mxu1 %v2397_v9 }
 0x552   :  { %1278 = vmatprep.subr.bf16.mxu0 %v2400_v17  ;;  %1319 = vmatprep.subr.bf16.mxu1 %v2403_v27 }
 0x553   :  { %1308 = vmatprep.mubr.bf16.mxu0 %v2558_v55  ;;  %1349 = vmatprep.mubr.bf16.mxu1 %v2558_v55 }
 0x555   :  { %1279 = vmatpush1.bf16.msra.mxu0 %v2408_v37  ;;  %1320 = vmatpush1.bf16.msra.mxu1 %v2411_v6 }
 0x556   :  { %1280 = vmatprep.subr.bf16.mxu0 %v2414_v2  ;;  %1321 = vmatprep.subr.bf16.mxu1 %v2417_v49 }
 0x559   :  { %1281 = vmatpush1.bf16.msra.mxu0 %v2420_v61  ;;  %1322 = vmatpush1.bf16.msra.mxu1 %v2423_v4 }
 0x55a   :  { %1282 = vmatprep.subr.bf16.mxu0 %v2426_v7  ;;  %1323 = vmatprep.subr.bf16.mxu1 %v2429_v51 }
 0x55d   :  { %1283 = vmatpush1.bf16.msra.mxu0 %v2432_v48  ;;  %1324 = vmatpush1.bf16.msra.mxu1 %v2435_v42 }
 0x55e   :  { %1284 = vmatprep.subr.bf16.mxu0 %v2438_v50  ;;  %1325 = vmatprep.subr.bf16.mxu1 %v2441_v1 }
 0x561   :  { %1285 = vmatpush1.bf16.msra.mxu0 %v2444_v53  ;;  %1326 = vmatpush1.bf16.msra.mxu1 %v2447_v52 }
 0x562   :  { %1286 = vmatprep.subr.bf16.mxu0 %v2450_v13  ;;  %1327 = vmatprep.subr.bf16.mxu1 %v2453_v14 }
 0x565   :  { %1287 = vmatpush1.bf16.msra.mxu0 %v2456_v15  ;;  %1328 = vmatpush1.bf16.msra.mxu1 %v2459_v16 }
 0x566   :  { %1288 = vmatprep.subr.bf16.mxu0 %v2071_v38  ;;  %1329 = vmatprep.subr.bf16.mxu1 %v2073_v39 }
 0x569   :  { %1289 = vmatpush1.bf16.msra.mxu0 %v2077_v40  ;;  %1330 = vmatpush1.bf16.msra.mxu1 %v2079_v41 }
 0x56a   :  { %1290 = vmatprep.subr.bf16.mxu0 %v2090_v43  ;;  %1331 = vmatprep.subr.bf16.mxu1 %v2092_v44 }
 0x56d   :  { %1291 = vmatpush1.bf16.msra.mxu0 %v2096_v45  ;;  %1332 = vmatpush1.bf16.msra.mxu1 %v2098_v46 }
 0x56e   :  { %1394 = vmatprep.subr.bf16.mxu0 %v2380_v10  ;;  %1435 = vmatprep.subr.bf16.mxu1 %v2383_v11 }
 0x623   :  { %v1192_v18 = vpop.f32.mrb[36].mxu0  ;;  %v1233_v38 = vpop.f32.mrb[36].mxu1 }
 0x624   :  { %v1240_v39 = vadd.f32 %v1192_v18, %v2568_v19  ;;  %v1242_v40 = vadd.f32 %v1233_v38, %v2569_v20  ;;  %v1194_v21 = vpop.f32.mrb[37].mxu0  ;;  %v1235_v41 = vpop.f32.mrb[37].mxu1 }
 0x625   :  { %v1241_v43 = vadd.f32 %v1194_v21, %v2570_v23  ;;  %v1243_v44 = vadd.f32 %v1235_v41, %v2571_v24  ;;  %v1196_v25 = vpop.f32.mrb[38].mxu0  ;;  %v1237_v45 = vpop.f32.mrb[38].mxu1 }
 0x626   :  { %v1617_v26 = vmul.f32 -1.442695, %v1240_v39  ;;  %v1197_v46 = vpop.f32.mrb[39].mxu0  ;;  %v1238_v28 = vpop.f32.mrb[39].mxu1 }
 0x627   :  { %v1618_v10 = vmul.f32 -1.442695, %v1241_v43  ;;  %v1619_v11 = vmul.f32 -1.442695, %v1243_v44  ;;  %v2576_v28 = vld [vmem:[#allocation27_spill] sm:$0xff] }
 0x628   :  { %1765 = vpow2.f32 %v1617_v26 }
 0x629   :  { %1767 = vpow2.f32 %v1618_v10 }
 0x62a   :  { %1769 = vpow2.f32 %v1619_v11  ;;  %v2577_v11 = vld [vmem:[#allocation28_spill] sm:$0xff] }
 0x62b   :  { %1771 = vtanh.f32 %v1242_v40 }
 0x632   :  { %v1766_v29 = vpop.eup %1765 }
 0x633   :  { %v1768_v30 = vpop.eup %1767  ;;  %v1247_v31 = vadd.f32 1.0, %v1766_v29 }
 0x634   :  { %v1253_v33 = vadd.f32 1.0, %v1768_v30  ;;  %v1770_v34 = vpop.eup %1769 }
 0x635   :  { %1773 = vrcp.f32 %v1247_v31  ;;  %v1772_v35 = vpop.eup %1771  ;;  %v1260_v56 = vadd.f32 1.0, %v1770_v34 }
 0x636   :  { %1775 = vrcp.f32 %v1253_v33  ;;  %v2578_v33 = vld [vmem:[#allocation29_spill] sm:$0xff] }
 0x637   :  { %1777 = vrcp.f32 %v1260_v56 }
 0x63f   :  { %v1774_v36 = vpop.eup %1773 }
 0x640   :  { %v1776_v22 = vpop.eup %1775  ;;  %v1264_v54 = vmul.f32 %v1774_v36, %v1772_v35  ;;  %v2579_v35 = vld [vmem:[#allocation30_spill] sm:$0xff] }
 0x641   :  { %v1263_v58 = vmul.f32 %v1776_v22, %v2391_v47  ;;  %v1778_v59 = vpop.eup %1777  ;;  %v1839_v47 = vld [vmem:[#allocation4 + $0xc0] ss:$16 sps:$4 sm:$0xff]  }
 0x643   :  { %v2477_v57 = vadd.f32 %v1264_v54, %v1263_v58 }
 0x645   :  { %1779 = vtanh.f32 %v2477_v57 }
 0x64f   :  { %v1780_v60 = vpop.eup %1779 }
 0x650   :  { %v1267_v62 = vmul.f32 %v1780_v60, %v1778_v59 }
 0x652   :  { %v1275_v12 = vpack.c.bf16 %v1267_v62, %v1267_v62 }
 0x654   :  { %1309 = vmatmul.mubr.bf16.vlgmr.msra.gmra.mrb[40].mxu0 %v1275_v12  ;;  %1350 = vmatmul.mubr.bf16.vlgmr.msra.gmra.mrb[40].mxu1 %v1275_v12 }
 0x655   :  { %1395 = vmatpush1.bf16.msra.mxu0 %v2394_v8  ;;  %1436 = vmatpush1.bf16.msra.mxu1 %v2397_v9  ;;  %v1844_v8 = vld [vmem:[#allocation4 + $0xe8] ss:$16 sps:$4 sm:$0xff]  }
 0x656   :  { %1396 = vmatprep.subr.bf16.mxu0 %v2400_v17  ;;  %1437 = vmatprep.subr.bf16.mxu1 %v2403_v27  ;;  %v2572_v27 = vld [vmem:[#allocation23_spill] sm:$0xff] }
 0x657   :  { %1426 = vmatprep.mubr.bf16.mxu0 %v2558_v55  ;;  %1467 = vmatprep.mubr.bf16.mxu1 %v2558_v55  ;;  %v1837_v55 = vld [vmem:[#allocation4 + $0xc4] ss:$16 sps:$4 sm:$0xff]  }
 0x659   :  { %1397 = vmatpush1.bf16.msra.mxu0 %v2408_v37  ;;  %1438 = vmatpush1.bf16.msra.mxu1 %v2411_v6  ;;  %v2573_v6 = vld [vmem:[#allocation24_spill] sm:$0xff] }
 0x65a   :  { %1398 = vmatprep.subr.bf16.mxu0 %v2414_v2  ;;  %1439 = vmatprep.subr.bf16.mxu1 %v2417_v49 }
 0x65d   :  { %1399 = vmatpush1.bf16.msra.mxu0 %v2420_v61  ;;  %1440 = vmatpush1.bf16.msra.mxu1 %v2423_v4  ;;  %v2574_v4 = vld [vmem:[#allocation25_spill] sm:$0xff] }
 0x65e   :  { %1400 = vmatprep.subr.bf16.mxu0 %v2426_v7  ;;  %1441 = vmatprep.subr.bf16.mxu1 %v2429_v51  ;;  %v2575_v51 = vld [vmem:[#allocation26_spill] sm:$0xff] }
 0x661   :  { %1401 = vmatpush1.bf16.msra.mxu0 %v2432_v48  ;;  %1442 = vmatpush1.bf16.msra.mxu1 %v2435_v42 }
 0x662   :  { %1402 = vmatprep.subr.bf16.mxu0 %v2438_v50  ;;  %1443 = vmatprep.subr.bf16.mxu1 %v2441_v1 }
 0x665   :  { %1403 = vmatpush1.bf16.msra.mxu0 %v2444_v53  ;;  %1444 = vmatpush1.bf16.msra.mxu1 %v2447_v52 }
 0x666   :  { %1404 = vmatprep.subr.bf16.mxu0 %v2450_v13  ;;  %1445 = vmatprep.subr.bf16.mxu1 %v2453_v14 }
 0x669   :  { %1405 = vmatpush1.bf16.msra.mxu0 %v2456_v15  ;;  %1446 = vmatpush1.bf16.msra.mxu1 %v2459_v16 }
 0x66a   :  { %1406 = vmatprep.subr.bf16.mxu0 %v1837_v55  ;;  %1447 = vmatprep.subr.bf16.mxu1 %v1838_v32 }
 0x66d   :  { %1407 = vmatpush1.bf16.msra.mxu0 %v1839_v47  ;;  %1448 = vmatpush1.bf16.msra.mxu1 %v1840_v0 }
 0x66e   :  { %1408 = vmatprep.subr.bf16.mxu0 %v1841_v3  ;;  %1449 = vmatprep.subr.bf16.mxu1 %v1842_v5 }
 0x671   :  { %1409 = vmatpush1.bf16.msra.mxu0 %v1843_v63  ;;  %1450 = vmatpush1.bf16.msra.mxu1 %v1844_v8 }
 0x727   :  { %v1310_v9 = vpop.f32.mrb[40].mxu0  ;;  %v1351_v17 = vpop.f32.mrb[40].mxu1 }
 0x728   :  { %v1358_v37 = vadd.f32 %v1310_v9, %v2572_v27  ;;  %v1360_v2 = vadd.f32 %v1351_v17, %v2573_v6  ;;  %v1312_v49 = vpop.f32.mrb[41].mxu0  ;;  %v1353_v61 = vpop.f32.mrb[41].mxu1  ;;  %v1626_v6 = vld [vmem:[%s2532_s4] ss:$0 sm:$0xff] }
 0x729   :  { %v1359_v7 = vadd.f32 %v1312_v49, %v2574_v4  ;;  %v1361_v48 = vadd.f32 %v1353_v61, %v2575_v51  ;;  %v1314_v42 = vpop.f32.mrb[42].mxu0  ;;  %v1355_v50 = vpop.f32.mrb[42].mxu1  ;;  %v1627_v61 = vld [vmem:[#allocation3] ss:$0 sm:$0xff] }
 0x72a   :  { %v1620_v1 = vmul.f32 -1.442695, %v1358_v37  ;;  %v1315_v53 = vpop.f32.mrb[43].mxu0  ;;  %v1356_v52 = vpop.f32.mrb[43].mxu1 }
 0x72b   :  { %v1621_v13 = vmul.f32 -1.442695, %v1359_v7  ;;  %v1622_v14 = vmul.f32 -1.442695, %v1361_v48 }
 0x72c   :  { %1781 = vpow2.f32 %v1620_v1 }
 0x72d   :  { %1783 = vpow2.f32 %v1621_v13 }
 0x72e   :  { %1785 = vpow2.f32 %v1622_v14 }
 0x72f   :  { %1787 = vtanh.f32 %v1360_v2 }
 0x736   :  { %v1782_v15 = vpop.eup %1781 }
 0x737   :  { %v1784_v16 = vpop.eup %1783  ;;  %v1365_v18 = vadd.f32 1.0, %v1782_v15 }
 0x738   :  { %v1371_v38 = vadd.f32 1.0, %v1784_v16  ;;  %v1786_v19 = vpop.eup %1785 }
 0x739   :  { %1789 = vrcp.f32 %v1365_v18  ;;  %v1788_v39 = vpop.eup %1787  ;;  %v1378_v41 = vadd.f32 1.0, %v1786_v19 }
 0x73a   :  { %1791 = vrcp.f32 %v1371_v38 }
 0x73b   :  { %1793 = vrcp.f32 %v1378_v41 }
 0x743   :  { %v1790_v20 = vpop.eup %1789 }
 0x744   :  { %v1792_v40 = vpop.eup %1791  ;;  %v1382_v21 = vmul.f32 %v1790_v20, %v1788_v39 }
 0x745   :  { %v1381_v23 = vmul.f32 %v1792_v40, %v2477_v57  ;;  %v1794_v24 = vpop.eup %1793 }
 0x747   :  { %v1383_v43 = vadd.f32 %v1382_v21, %v1381_v23 }
 0x749   :  { %1795 = vtanh.f32 %v1383_v43 }
 0x753   :  { %v1796_v44 = vpop.eup %1795 }
 0x754   :  { %v1385_v25 = vmul.f32 %v1796_v44, %v1794_v24 }
 0x756   :  { %v1393_v45 = vpack.c.bf16 %v1385_v25, %v1385_v25 }
 0x758   :  { %1427 = vmatmul.mubr.bf16.vlgmr.msra.gmra.mrb[44].mxu0 %v1393_v45  ;;  %1468 = vmatmul.mubr.bf16.vlgmr.msra.gmra.mrb[44].mxu1 %v1393_v45 }
 0x82b   :  { %v1428_v26 = vpop.f32.mrb[44].mxu0  ;;  %v1469_v46 = vpop.f32.mrb[44].mxu1 }
 0x82c   :  { %v1476_v10 = vadd.f32 %v1428_v26, %v2576_v28  ;;  %v1478_v29 = vadd.f32 %v1469_v46, %v2577_v11  ;;  %v1430_v30 = vpop.f32.mrb[45].mxu0  ;;  %v1471_v31 = vpop.f32.mrb[45].mxu1 }
 0x82d   :  { %v1477_v34 = vadd.f32 %v1430_v30, %v2578_v33  ;;  %v1479_v36 = vadd.f32 %v1471_v31, %v2579_v35  ;;  %v1432_v22 = vpop.f32.mrb[46].mxu0  ;;  %v1473_v54 = vpop.f32.mrb[46].mxu1 }
 0x82e   :  { %v1623_v56 = vmul.f32 -1.442695, %v1476_v10  ;;  %v1433_v58 = vpop.f32.mrb[47].mxu0  ;;  %v1474_v57 = vpop.f32.mrb[47].mxu1 }
 0x82f   :  { %v1624_v59 = vmul.f32 -1.442695, %v1477_v34  ;;  %v1625_v60 = vmul.f32 -1.442695, %v1479_v36 }
 0x830   :  { %1797 = vpow2.f32 %v1623_v56 }
 0x831   :  { %1799 = vpow2.f32 %v1624_v59 }
 0x832   :  { %1801 = vpow2.f32 %v1625_v60 }
 0x833   :  { %1803 = vtanh.f32 %v1478_v29 }
 0x83a   :  { %v1798_v62 = vpop.eup %1797 }
 0x83b   :  { %v1800_v12 = vpop.eup %1799  ;;  %v1483_v55 = vadd.f32 1.0, %v1798_v62 }
 0x83c   :  { %v1489_v32 = vadd.f32 1.0, %v1800_v12  ;;  %v1802_v47 = vpop.eup %1801 }
 0x83d   :  { %1805 = vrcp.f32 %v1483_v55  ;;  %v1804_v0 = vpop.eup %1803  ;;  %v1496_v8 = vadd.f32 1.0, %v1802_v47 }
 0x83e   :  { %1807 = vrcp.f32 %v1489_v32 }
 0x83f   :  { %1809 = vrcp.f32 %v1496_v8 }
 0x847   :  { %v1806_v3 = vpop.eup %1805 }
 0x848   :  { %v1808_v5 = vpop.eup %1807  ;;  %v1500_v63 = vmul.f32 %v1806_v3, %v1804_v0 }
 0x849   :  { %v1499_v9 = vmul.f32 %v1808_v5, %v1383_v43  ;;  %v1810_v27 = vpop.eup %1809 }
 0x84b   :  { %v1501_v17 = vadd.f32 %v1500_v63, %v1499_v9 }
 0x84d   :  { %1811 = vtanh.f32 %v1501_v17 }
 0x857   :  { %v1812_v37 = vpop.eup %1811 }
 0x858   :  { %v1503_v2 = vmul.f32 %v1812_v37, %v1810_v27 }
 0x85a   :  { %v1511_v49 = vmul.f32 %v1626_v6, %v1503_v2 }
 0x85c   :  { %1512 = vadd.xlane.f32.xlu0 %v1511_v49 }
 0x8e9   :  { %v1513_v4 = vpop.xlane.xlu0 %1512 }
 0x8ea   :  { %v1521_v7 = vadd.f32 %v1627_v61, %v1513_v4 }
 0x8ec   :  { %1524 = vperm.xlu0 %1634, %v1521_v7  }
 0x96b   :  { %v1525_v51 = vpop.permute.xlu0 %1524 }
 0x96c   :  { %1527 = vst [vmem:[#allocation7] sm:$0xff] %v1525_v51 }
 0x96d   :  { %1878 = shalt.err (!%p1875_p12)
}
 0x96e   :  { %s1879_s11 = scalar_lea.hbm %s2534_s6, 128 }
 0x96f   :  { %p1880_p13 = scmp.ne.s32.totalorder %s2534_s6, %s1879_s11  ;;  %p1883_p0 = scmp.lt.u32.totalorder %s1879_s11, %s2534_s6 }
 0x971   :  { %p1885_p1 = pnand %p1883_p0, %p1880_p13 }
 0x973   :  { %1888 = shalt.err (!%p1885_p1)
}
 0x974   :  { %1537 = dma.vmem_to_hbm [thread:$0]  %s1535_s8, 128, %s2534_s6, [#allocation6]  }
 0x975   :  { %1891 = dma.done.wait [#allocation6], 128  }
 0x976   :  { %1892 = vsyncadd [#allocation6], 4294967168 }
 0x977   :  { %1541 = vsyncpa [#allocation5], 1 }
 0x978   :  { %1542 = vsyncpa [#allocation6], 1 }

</bundles_post_ra>
